<compile_context>
chip_gen: v7x
topology: tpu7x:2x2x1
jax: 0.10.0
libtpu: 0.0.40
codegen_flags: <defaults>
</compile_context>

<pallas_src>
import functools

import jax
import jax.numpy as jnp
from jax.experimental import pallas as pl
from jax.experimental.pallas import tpu as pltpu


# --------------------------------------------------------------------------
# Fused per-level Pallas kernel
# --------------------------------------------------------------------------

def _fpn_level_kernel(x_ref, *rest, h, w, cout, has_skip):
    """Fused per-level FPN step for a block of `nb` images:
       1x1 lateral conv(+BN)  [+ nearest-2x upsampled top-down add]
       -> zero-pad (persistent VMEM scratch) -> 3x3 conv(+BN)."""
    if has_skip:
        prev_ref, wlat_ref, lshift_ref, wfin_ref, fshift_ref, o_ref, pad_ref = rest
    else:
        wlat_ref, lshift_ref, wfin_ref, fshift_ref, o_ref, pad_ref = rest
        prev_ref = None

    cdt = wlat_ref.dtype                     # MXU operand dtype (f32 or bf16)
    nb = x_ref.shape[0]
    cin = x_ref.shape[-1]
    m = nb * h * w

    # ---- 1x1 lateral conv (BN scale folded into weights), f32 accumulation.
    xm = x_ref[...].reshape(m, cin).astype(cdt)
    lat = jnp.dot(xm, wlat_ref[...], preferred_element_type=jnp.float32)
    lat = (lat + lshift_ref[...]).reshape(nb, h, w, cout)

    # ---- top-down add: broadcast coarser level into the 2x-upsampled view
    # (no materialized `up` buffer).
    if has_skip:
        hc, wc = h // 2, w // 2
        p = prev_ref[...].astype(jnp.float32)                  # (nb, hc, wc, c)
        lat = (lat.reshape(nb, hc, 2, wc, 2, cout)
               + p[:, :, None, :, None, :]).reshape(nb, h, w, cout)

    # ---- zero-padded pre-activation in a persistent VMEM scratch.
    # Re-zero only the 1-px border each step (tiny), store the interior once.
    zrow = jnp.zeros((nb, 1, w + 2, cout), cdt)
    pad_ref[:, 0:1, :, :] = zrow
    pad_ref[:, h + 1:h + 2, :, :] = zrow
    zcol = jnp.zeros((nb, h, 1, cout), cdt)
    pad_ref[:, 1:h + 1, 0:1, :] = zcol
    pad_ref[:, 1:h + 1, w + 1:w + 2, :] = zcol
    pad_ref[:, 1:h + 1, 1:w + 1, :] = lat.astype(cdt)

    # ---- 3x3 conv: K = 3*cout row_cat + 3 accumulated dy-dots (no 9x im2col).
    pp = pad_ref[...]                                          # (nb,h+2,w+2,c)
    row_cat = jnp.concatenate([pp[:, :, dx:dx + w, :] for dx in range(3)],
                              axis=-1)                         # (nb,h+2,w,3c)
    acc = jnp.zeros((m, cout), jnp.float32)
    for dy in range(3):                                        # static unroll
        win = row_cat[:, dy:dy + h, :, :].reshape(m, 3 * cout)
        acc = acc + jnp.dot(win, wfin_ref[dy],
                            preferred_element_type=jnp.float32)
    y = acc + fshift_ref[...]
    o_ref[...] = y.reshape(nb, h, w, cout).astype(o_ref.dtype)


# --------------------------------------------------------------------------
# VMEM budgeting (per TPU generation) and per-step image-block selection
# --------------------------------------------------------------------------

def _vmem_budget_bytes():
    """75% of physical VMEM (v5e/v6e: 128 MiB, v7x: 64 MiB)."""
    try:
        cap = int(pltpu.get_tpu_info().vmem_capacity_bytes)
    except Exception:
        cap = 128 * 1024 * 1024
    return cap * 3 // 4


def _level_vmem_bytes(nb, h, w, cin, cout, x_isz, prev_isz, out_isz, w_isz,
                      cdt_isz, has_skip):
    """Rough per-grid-step VMEM footprint: pipelined I/O + weights + scratch."""
    m = nb * h * w
    io = 2 * (m * cin * x_isz + m * cout * out_isz)            # double-buffered
    if has_skip:
        io += 2 * nb * (h // 2) * (w // 2) * cout * prev_isz
    weights = 2 * (cin * cout + 9 * cout * cout) * w_isz + 2 * 2 * cout * 4
    scratch = nb * (h + 2) * (w + 2) * cout * cdt_isz
    temps = 2 * m * cout * 4 + nb * (h + 2) * w * 3 * cout * cdt_isz
    return int(1.3 * (io + weights + scratch + temps))


def _pick_images_per_step(n, est_fn, budget):
    for nb in range(n, 0, -1):
        if n % nb == 0 and est_fn(nb) <= budget:
            return nb
    # TODO(synk): if even nb=1 exceeds budget, fall back to row-strip tiling.
    return 1


# --------------------------------------------------------------------------
# Per-level wrapper
# --------------------------------------------------------------------------

def fpn_level_fused(x, prev, lvl, *, images_per_step=None):
    """x: (N,H,W,Cin).  prev: coarser-level output (N,H/2,W/2,Cout) or None."""
    n, h, w, cin = x.shape
    wlat, lat_shift = lvl['wlat'], lvl['lat_shift']
    wfin, fin_shift = lvl['wfin'], lvl['fin_shift']
    cout = wlat.shape[-1]
    cdt = wlat.dtype
    has_skip = prev is not None
    out_dtype = cdt   # prev-chain & outputs in compute dtype (bf16 halves HBM traffic)

    budget = _vmem_budget_bytes()
    if images_per_step is None:
        def est(nb):
            return _level_vmem_bytes(
                nb, h, w, cin, cout, x.dtype.itemsize,
                prev.dtype.itemsize if has_skip else 0,
                jnp.dtype(out_dtype).itemsize, wlat.dtype.itemsize,
                jnp.dtype(cdt).itemsize, has_skip)
        nb = _pick_images_per_step(n, est, budget)
    else:
        nb = images_per_step
    assert n % nb == 0, (n, nb)

    kernel = functools.partial(_fpn_level_kernel, h=h, w=w, cout=cout,
                               has_skip=has_skip)

    inputs = [x]
    in_specs = [pl.BlockSpec((nb, h, w, cin), lambda b: (b, 0, 0, 0))]
    if has_skip:
        assert prev.shape == (n, h // 2, w // 2, cout), (prev.shape, x.shape)
        inputs.append(prev)
        in_specs.append(
            pl.BlockSpec((nb, h // 2, w // 2, cout), lambda b: (b, 0, 0, 0)))
    inputs += [wlat, lat_shift, wfin, fin_shift]
    in_specs += [
        pl.BlockSpec((cin, cout), lambda b: (0, 0)),
        pl.BlockSpec((1, cout), lambda b: (0, 0)),
        pl.BlockSpec((3, 3 * cout, cout), lambda b: (0, 0, 0)),
        pl.BlockSpec((1, cout), lambda b: (0, 0)),
    ]

    flops = 2 * n * h * w * cout * (cin + 9 * cout)
    bytes_accessed = (
        x.size * x.dtype.itemsize
        + (prev.size * prev.dtype.itemsize if has_skip else 0)
        + wlat.size * wlat.dtype.itemsize + wfin.size * wfin.dtype.itemsize
        + 2 * cout * 4 + n * h * w * cout * jnp.dtype(out_dtype).itemsize)

    return pl.pallas_call(
        kernel,
        grid=(n // nb,),
        out_shape=jax.ShapeDtypeStruct((n, h, w, cout), out_dtype),
        in_specs=in_specs,
        out_specs=pl.BlockSpec((nb, h, w, cout), lambda b: (b, 0, 0, 0)),
        scratch_shapes=[pltpu.VMEM((nb, h + 2, w + 2, cout), cdt)],
        compiler_params=pltpu.CompilerParams(
            dimension_semantics=("parallel",),
            vmem_limit_bytes=budget),
        cost_estimate=pl.CostEstimate(flops=flops, transcendentals=0,
                                      bytes_accessed=bytes_accessed),
    )(*inputs)


# --------------------------------------------------------------------------
# Parameters: init (raw ConvBN params) + trace-time BN folding
# --------------------------------------------------------------------------

_BN_EPS = 1e-5


def init_fpn_params(key, in_channels, out_channels):
    params = {}
    for level_key, cin in in_channels.items():
        key, *sub = jax.random.split(key, 9)
        lat_w = jax.random.normal(sub[0], (cin, out_channels), jnp.float32) * 0.1
        fin_w = jax.random.normal(sub[1], (3, 3, out_channels, out_channels),
                                  jnp.float32) * 0.02
        # BatchNorm running stats / affine (eval mode)
        lat_gamma = 1.0 + 0.1 * jax.random.normal(sub[2], (out_channels,))
        lat_beta = 0.1 * jax.random.normal(sub[3], (out_channels,))
        lat_mean = 0.1 * jax.random.normal(sub[4], (out_channels,))
        lat_var = jnp.abs(jax.random.normal(sub[5], (out_channels,))) + 0.5
        fin_gamma = 1.0 + 0.1 * jax.random.normal(sub[6], (out_channels,))
        fin_beta = 0.1 * jax.random.normal(sub[7], (out_channels,))
        fin_mean = jnp.zeros((out_channels,))
        fin_var = jnp.ones((out_channels,))

        lat_scale = lat_gamma / jnp.sqrt(lat_var + _BN_EPS)
        lat_shift = lat_beta - lat_mean * lat_scale
        fin_scale = fin_gamma / jnp.sqrt(fin_var + _BN_EPS)
        fin_shift = fin_beta - fin_mean * fin_scale
        params[level_key] = dict(
            lat_w=lat_w, lat_scale=lat_scale, lat_shift=lat_shift,
            fin_w=fin_w, fin_scale=fin_scale, fin_shift=fin_shift)
    return params


def fold_params(params, compute_dtype=jnp.float32):
    """Fold BN scale into conv weights; reshape 3x3 weight to (3, 3*Cout, Cout)
    so the kernel can take one (3*Cout, Cout) chunk per dy."""
    folded = {}
    for k, p in params.items():
        cout = p['lat_w'].shape[1]
        wlat = (p['lat_w'] * p['lat_scale'][None, :]).astype(compute_dtype)
        wfin = (p['fin_w'] * p['fin_scale'][None, None, None, :]
                ).reshape(3, 3 * cout, cout).astype(compute_dtype)
        folded[k] = dict(
            wlat=wlat,
            lat_shift=p['lat_shift'].reshape(1, cout).astype(jnp.float32),
            wfin=wfin,
            fin_shift=p['fin_shift'].reshape(1, cout).astype(jnp.float32))
    return folded


# --------------------------------------------------------------------------
# FPN forward (matches the PyTorch loop: coarsest level first, top-down adds)
# --------------------------------------------------------------------------

def fpn_forward(features, folded_params, *, images_per_step=None):
    keys = list(features.keys())
    output = {}
    for i in range(len(keys) - 1, -1, -1):
        k = keys[i]
        prev = None if i == len(keys) - 1 else output[keys[i + 1]]
        output[k] = fpn_level_fused(features[k], prev, folded_params[k],
                                    images_per_step=images_per_step)
    return output


# --------------------------------------------------------------------------
# Pure-JAX reference (for correctness check)
# --------------------------------------------------------------------------

def _ref_conv(x, w_hwio, scale, shift):
    y = jax.lax.conv_general_dilated(
        x, w_hwio, window_strides=(1, 1), padding='SAME',
        dimension_numbers=('NHWC', 'HWIO', 'NHWC'))
    return y * scale[None, None, None, :] + shift[None, None, None, :]


def upsample_nearest_2x(x):
    return jnp.repeat(jnp.repeat(x, 2, axis=1), 2, axis=2)


def fpn_forward_ref(features, params):
    keys = list(features.keys())
    output = {}
    for i in range(len(keys) - 1, -1, -1):
        k = keys[i]
        p = params[k]
        cin, cout = p['lat_w'].shape
        lat = _ref_conv(features[k], p['lat_w'].reshape(1, 1, cin, cout),
                        p['lat_scale'], p['lat_shift'])
        if i == len(keys) - 1:
            x = lat
        else:
            x = lat + upsample_nearest_2x(output[keys[i + 1]])
        output[k] = _ref_conv(x, p['fin_w'], p['fin_scale'], p['fin_shift'])
    return output


# --------------------------------------------------------------------------
# Main
# --------------------------------------------------------------------------

if __name__ == "__main__":
    # Small spatial shapes, production out_channels=256 (fills the 256-wide MXU
    # on v6e/v7x; v5e's 128-wide MXU is also fully fed).
    in_channels = {'3': 24, '6': 32, '13': 96, '18': 160}
    out_channels = 256
    batch = 2
    spatial = {'3': 16, '6': 8, '13': 4, '18': 2}   # each level 2x coarser

    key = jax.random.PRNGKey(0)
    key, pkey = jax.random.split(key)
    params = init_fpn_params(pkey, in_channels, out_channels)

    features = {}
    for k, cin in in_channels.items():
        key, sub = jax.random.split(key)
        s = spatial[k]
        features[k] = jax.random.normal(sub, (batch, s, s, cin), jnp.float32)

    ref = fpn_forward_ref(features, params)

    # f32 operands, one image per grid step (exercises grid=(batch,)):
    # exact-semantics check against the XLA conv reference.
    out_f32 = fpn_forward(features, fold_params(params, jnp.float32),
                          images_per_step=1)
    out_f32 = jax.tree_util.tree_map(jax.block_until_ready, out_f32)
    for k in features:
        assert out_f32[k].shape == (batch, spatial[k], spatial[k], out_channels)
        assert bool(jnp.allclose(out_f32[k], ref[k], atol=1e-3, rtol=1e-3)), k

    # bf16 operands + bf16 prev chain / outputs, batch folded into one grid
    # step by the VMEM-budget heuristic (valid on v5e/v6e/v7x; f32 MXU accum).
    out_bf16 = fpn_forward(features, fold_params(params, jnp.bfloat16))
    out_bf16 = jax.tree_util.tree_map(jax.block_until_ready, out_bf16)
    for k in features:
        assert out_bf16[k].shape == (batch, spatial[k], spatial[k], out_channels)
        # Looser tolerance: bf16 operands + bf16 top-down chain compound across
        # pyramid levels (reduced-precision fast path).
        assert bool(jnp.allclose(out_bf16[k].astype(jnp.float32), ref[k],
                                 atol=1e-1, rtol=1e-1)), k

    print("KERNEL_OK")
</pallas_src>

<mosaic_0001>
module attributes {stable_mosaic.version = 11 : i64} {
  func.func @_fpn_level_kernel(%arg0: i32, %arg1: memref<1x2x2x160xf32, #tpu.memory_space<vmem>>, %arg2: memref<160x256xf32, #tpu.memory_space<vmem>>, %arg3: memref<1x256xf32, #tpu.memory_space<vmem>>, %arg4: memref<3x768x256xf32, #tpu.memory_space<vmem>>, %arg5: memref<1x256xf32, #tpu.memory_space<vmem>>, %arg6: memref<1x2x2x256xf32, #tpu.memory_space<vmem>>, %arg7: memref<1x4x4x256xf32, #tpu.memory_space<vmem>>) attributes {dimension_semantics = [#tpu.dimension_semantics<parallel>], iteration_bounds = array<i64: 2>, scalar_prefetch = 0 : i64, scratch_operands = 1 : i64, tpu.core_type = #tpu.core_type<tc>, window_params = [{transform_indices = @transform_0, window_bounds = array<i64: 1, 2, 2, 160>}, {pipeline_mode = #tpu.pipeline_mode<synchronous>, transform_indices = @transform_1, window_bounds = array<i64: 160, 256>}, {pipeline_mode = #tpu.pipeline_mode<synchronous>, transform_indices = @transform_2, window_bounds = array<i64: 1, 256>}, {pipeline_mode = #tpu.pipeline_mode<synchronous>, transform_indices = @transform_3, window_bounds = array<i64: 3, 768, 256>}, {pipeline_mode = #tpu.pipeline_mode<synchronous>, transform_indices = @transform_4, window_bounds = array<i64: 1, 256>}, {transform_indices = @transform_5, window_bounds = array<i64: 1, 2, 2, 256>}]} {
    %c0 = arith.constant 0 : index
    %c0_0 = arith.constant 0 : index
    %c0_1 = arith.constant 0 : index
    %c0_2 = arith.constant 0 : index
    %0 = vector.load %arg1[%c0, %c0_0, %c0_1, %c0_2] : memref<1x2x2x160xf32, #tpu.memory_space<vmem>>, vector<1x2x2x160xf32>
    %1 = vector.shape_cast %0 : vector<1x2x2x160xf32> to vector<4x160xf32>
    %c0_3 = arith.constant 0 : index
    %c0_4 = arith.constant 0 : index
    %2 = vector.load %arg2[%c0_3, %c0_4] : memref<160x256xf32, #tpu.memory_space<vmem>>, vector<160x256xf32>
    %cst = arith.constant dense<0.000000e+00> : vector<4x256xf32>
    %3 = tpu.matmul %1, %2, %cst {dimension_numbers = #tpu.dot_dimension_numbers<[1], [0], [0], [1], [0, 0, 1, 1], [], []>} : vector<4x160xf32>, vector<160x256xf32>, vector<4x256xf32> -> vector<4x256xf32>
    %c0_5 = arith.constant 0 : index
    %c0_6 = arith.constant 0 : index
    %4 = vector.load %arg3[%c0_5, %c0_6] : memref<1x256xf32, #tpu.memory_space<vmem>>, vector<1x256xf32>
    %5 = vector.broadcast %4 : vector<1x256xf32> to vector<4x256xf32>
    %6 = arith.addf %3, %5 : vector<4x256xf32>
    %7 = vector.shape_cast %6 : vector<4x256xf32> to vector<1x2x2x256xf32>
    %cst_7 = arith.constant 0.000000e+00 : f32
    %8 = vector.broadcast %cst_7 : f32 to vector<1x1x4x256xf32>
    %c0_8 = arith.constant 0 : index
    %c0_9 = arith.constant 0 : index
    %c0_10 = arith.constant 0 : index
    %c0_11 = arith.constant 0 : index
    %9 = vector.load %arg7[%c0_8, %c0_9, %c0_10, %c0_11] : memref<1x4x4x256xf32, #tpu.memory_space<vmem>>, vector<1x1x4x256xf32>
    tpu.vector_store %arg7[%c0_8, %c0_9, %c0_10, %c0_11], %8 {strides = array<i32>} : memref<1x4x4x256xf32, #tpu.memory_space<vmem>>, vector<1x1x4x256xf32>,
    %c0_12 = arith.constant 0 : index
    %c3 = arith.constant 3 : index
    %c0_13 = arith.constant 0 : index
    %c0_14 = arith.constant 0 : index
    %10 = vector.load %arg7[%c0_12, %c3, %c0_13, %c0_14] : memref<1x4x4x256xf32, #tpu.memory_space<vmem>>, vector<1x1x4x256xf32>
    tpu.vector_store %arg7[%c0_12, %c3, %c0_13, %c0_14], %8 {strides = array<i32>} : memref<1x4x4x256xf32, #tpu.memory_space<vmem>>, vector<1x1x4x256xf32>,
    %cst_15 = arith.constant 0.000000e+00 : f32
    %11 = vector.broadcast %cst_15 : f32 to vector<1x2x1x256xf32>
    %c0_16 = arith.constant 0 : index
    %c1 = arith.constant 1 : index
    %c0_17 = arith.constant 0 : index
    %c0_18 = arith.constant 0 : index
    %12 = vector.load %arg7[%c0_16, %c1, %c0_17, %c0_18] : memref<1x4x4x256xf32, #tpu.memory_space<vmem>>, vector<1x2x1x256xf32>
    tpu.vector_store %arg7[%c0_16, %c1, %c0_17, %c0_18], %11 {strides = array<i32>} : memref<1x4x4x256xf32, #tpu.memory_space<vmem>>, vector<1x2x1x256xf32>,
    %c0_19 = arith.constant 0 : index
    %c1_20 = arith.constant 1 : index
    %c3_21 = arith.constant 3 : index
    %c0_22 = arith.constant 0 : index
    %13 = vector.load %arg7[%c0_19, %c1_20, %c3_21, %c0_22] : memref<1x4x4x256xf32, #tpu.memory_space<vmem>>, vector<1x2x1x256xf32>
    tpu.vector_store %arg7[%c0_19, %c1_20, %c3_21, %c0_22], %11 {strides = array<i32>} : memref<1x4x4x256xf32, #tpu.memory_space<vmem>>, vector<1x2x1x256xf32>,
    %c0_23 = arith.constant 0 : index
    %c1_24 = arith.constant 1 : index
    %c1_25 = arith.constant 1 : index
    %c0_26 = arith.constant 0 : index
    %14 = vector.load %arg7[%c0_23, %c1_24, %c1_25, %c0_26] : memref<1x4x4x256xf32, #tpu.memory_space<vmem>>, vector<1x2x2x256xf32>
    tpu.vector_store %arg7[%c0_23, %c1_24, %c1_25, %c0_26], %7 {strides = array<i32>} : memref<1x4x4x256xf32, #tpu.memory_space<vmem>>, vector<1x2x2x256xf32>,
    %c0_27 = arith.constant 0 : index
    %c0_28 = arith.constant 0 : index
    %c0_29 = arith.constant 0 : index
    %c0_30 = arith.constant 0 : index
    %15 = vector.load %arg7[%c0_27, %c0_28, %c0_29, %c0_30] : memref<1x4x4x256xf32, #tpu.memory_space<vmem>>, vector<1x4x4x256xf32>
    %16 = vector.extract_strided_slice %15 {offsets = [0, 0, 0, 0], sizes = [1, 4, 2, 256], strides = [1, 1, 1, 1]} : vector<1x4x4x256xf32> to vector<1x4x2x256xf32>
    %17 = vector.extract_strided_slice %15 {offsets = [0, 0, 1, 0], sizes = [1, 4, 2, 256], strides = [1, 1, 1, 1]} : vector<1x4x4x256xf32> to vector<1x4x2x256xf32>
    %18 = vector.extract_strided_slice %15 {offsets = [0, 0, 2, 0], sizes = [1, 4, 2, 256], strides = [1, 1, 1, 1]} : vector<1x4x4x256xf32> to vector<1x4x2x256xf32>
    %19 = tpu.concatenate %16, %17, %18 in 3 : vector<1x4x2x256xf32>, vector<1x4x2x256xf32>, vector<1x4x2x256xf32> -> vector<1x4x2x768xf32>
    %cst_31 = arith.constant 0.000000e+00 : f32
    %20 = vector.broadcast %cst_31 : f32 to vector<4x256xf32>
    %21 = vector.extract_strided_slice %19 {offsets = [0, 0, 0, 0], sizes = [1, 2, 2, 768], strides = [1, 1, 1, 1]} : vector<1x4x2x768xf32> to vector<1x2x2x768xf32>
    %22 = vector.shape_cast %21 : vector<1x2x2x768xf32> to vector<4x768xf32>
    %c0_32 = arith.constant 0 : index
    %c0_33 = arith.constant 0 : index
    %c0_34 = arith.constant 0 : index
    %23 = vector.load %arg4[%c0_32, %c0_33, %c0_34] : memref<3x768x256xf32, #tpu.memory_space<vmem>>, vector<1x768x256xf32>
    %24 = vector.shape_cast %23 : vector<1x768x256xf32> to vector<768x256xf32>
    %cst_35 = arith.constant dense<0.000000e+00> : vector<4x256xf32>
    %25 = tpu.matmul %22, %24, %cst_35 {dimension_numbers = #tpu.dot_dimension_numbers<[1], [0], [0], [1], [0, 0, 1, 1], [], []>} : vector<4x768xf32>, vector<768x256xf32>, vector<4x256xf32> -> vector<4x256xf32>
    %26 = arith.addf %20, %25 : vector<4x256xf32>
    %27 = vector.extract_strided_slice %19 {offsets = [0, 1, 0, 0], sizes = [1, 2, 2, 768], strides = [1, 1, 1, 1]} : vector<1x4x2x768xf32> to vector<1x2x2x768xf32>
    %28 = vector.shape_cast %27 : vector<1x2x2x768xf32> to vector<4x768xf32>
    %c1_36 = arith.constant 1 : index
    %c0_37 = arith.constant 0 : index
    %c0_38 = arith.constant 0 : index
    %29 = vector.load %arg4[%c1_36, %c0_37, %c0_38] : memref<3x768x256xf32, #tpu.memory_space<vmem>>, vector<1x768x256xf32>
    %30 = vector.shape_cast %29 : vector<1x768x256xf32> to vector<768x256xf32>
    %cst_39 = arith.constant dense<0.000000e+00> : vector<4x256xf32>
    %31 = tpu.matmul %28, %30, %cst_39 {dimension_numbers = #tpu.dot_dimension_numbers<[1], [0], [0], [1], [0, 0, 1, 1], [], []>} : vector<4x768xf32>, vector<768x256xf32>, vector<4x256xf32> -> vector<4x256xf32>
    %32 = arith.addf %26, %31 : vector<4x256xf32>
    %33 = vector.extract_strided_slice %19 {offsets = [0, 2, 0, 0], sizes = [1, 2, 2, 768], strides = [1, 1, 1, 1]} : vector<1x4x2x768xf32> to vector<1x2x2x768xf32>
    %34 = vector.shape_cast %33 : vector<1x2x2x768xf32> to vector<4x768xf32>
    %c2 = arith.constant 2 : index
    %c0_40 = arith.constant 0 : index
    %c0_41 = arith.constant 0 : index
    %35 = vector.load %arg4[%c2, %c0_40, %c0_41] : memref<3x768x256xf32, #tpu.memory_space<vmem>>, vector<1x768x256xf32>
    %36 = vector.shape_cast %35 : vector<1x768x256xf32> to vector<768x256xf32>
    %cst_42 = arith.constant dense<0.000000e+00> : vector<4x256xf32>
    %37 = tpu.matmul %34, %36, %cst_42 {dimension_numbers = #tpu.dot_dimension_numbers<[1], [0], [0], [1], [0, 0, 1, 1], [], []>} : vector<4x768xf32>, vector<768x256xf32>, vector<4x256xf32> -> vector<4x256xf32>
    %38 = arith.addf %32, %37 : vector<4x256xf32>
    %c0_43 = arith.constant 0 : index
    %c0_44 = arith.constant 0 : index
    %39 = vector.load %arg5[%c0_43, %c0_44] : memref<1x256xf32, #tpu.memory_space<vmem>>, vector<1x256xf32>
    %40 = vector.broadcast %39 : vector<1x256xf32> to vector<4x256xf32>
    %41 = arith.addf %38, %40 : vector<4x256xf32>
    %42 = vector.shape_cast %41 : vector<4x256xf32> to vector<1x2x2x256xf32>
    %c0_45 = arith.constant 0 : index
    %c0_46 = arith.constant 0 : index
    %c0_47 = arith.constant 0 : index
    %c0_48 = arith.constant 0 : index
    %43 = vector.load %arg6[%c0_45, %c0_46, %c0_47, %c0_48] : memref<1x2x2x256xf32, #tpu.memory_space<vmem>>, vector<1x2x2x256xf32>
    tpu.vector_store %arg6[%c0_45, %c0_46, %c0_47, %c0_48], %42 {strides = array<i32>} : memref<1x2x2x256xf32, #tpu.memory_space<vmem>>, vector<1x2x2x256xf32>,
    return
  }
  func.func @transform_0(%arg0: i32) -> (i32, i32, i32, i32) {
    %c0_i32 = arith.constant 0 : i32
    %c0_i32_0 = arith.constant 0 : i32
    %c0_i32_1 = arith.constant 0 : i32
    %c0_i32_2 = arith.constant 0 : i32
    return %arg0, %c0_i32, %c0_i32_0, %c0_i32_1 : i32, i32, i32, i32
  }
  func.func @transform_1(%arg0: i32) -> (i32, i32) {
    %c0_i32 = arith.constant 0 : i32
    %c0_i32_0 = arith.constant 0 : i32
    %c0_i32_1 = arith.constant 0 : i32
    return %c0_i32, %c0_i32_0 : i32, i32
  }
  func.func @transform_2(%arg0: i32) -> (i32, i32) {
    %c0_i32 = arith.constant 0 : i32
    %c0_i32_0 = arith.constant 0 : i32
    %c0_i32_1 = arith.constant 0 : i32
    return %c0_i32, %c0_i32_0 : i32, i32
  }
  func.func @transform_3(%arg0: i32) -> (i32, i32, i32) {
    %c0_i32 = arith.constant 0 : i32
    %c0_i32_0 = arith.constant 0 : i32
    %c0_i32_1 = arith.constant 0 : i32
    %c0_i32_2 = arith.constant 0 : i32
    return %c0_i32, %c0_i32_0, %c0_i32_1 : i32, i32, i32
  }
  func.func @transform_4(%arg0: i32) -> (i32, i32) {
    %c0_i32 = arith.constant 0 : i32
    %c0_i32_0 = arith.constant 0 : i32
    %c0_i32_1 = arith.constant 0 : i32
    return %c0_i32, %c0_i32_0 : i32, i32
  }
  func.func @transform_5(%arg0: i32) -> (i32, i32, i32, i32) {
    %c0_i32 = arith.constant 0 : i32
    %c0_i32_0 = arith.constant 0 : i32
    %c0_i32_1 = arith.constant 0 : i32
    %c0_i32_2 = arith.constant 0 : i32
    return %arg0, %c0_i32, %c0_i32_0, %c0_i32_1 : i32, i32, i32, i32
  }
}

</mosaic_0001>

<bundles_post_ra>
// kernel: tpu_custom_call.1
= control target key start
LH: loop header
LB: loop body
LE: loop exit
PB: predicated region body
PF: predicated region fallthrough
CT: control target
= control target key end

     0   :  { %10 = vsyncpa [#allocation4], 0  ;;  %s3530_s0 = inlined_call_operand.hbm [shape: f32[2,2,2,160], index: 0, kind: input, shape index: {}]   ;;  %s3531_s1 = inlined_call_operand.hbm [shape: f32[160,256], index: 1, kind: input, shape index: {}]   ;;  %s3532_s2 = inlined_call_operand.hbm [shape: f32[1,256], index: 2, kind: input, shape index: {}]   ;;  %s3533_s3 = inlined_call_operand.hbm [shape: f32[3,768,256], index: 3, kind: input, shape index: {}]   ;;  %s3534_s4 = inlined_call_operand.hbm [shape: f32[1,256], index: 4, kind: input, shape index: {}]   ;;  %s3535_s5 = inlined_call_operand.hbm [shape: f32[2,2,2,256], index: 5, kind: output, shape index: {}]  }
   0x1   :  { %12 = vsyncpa [#allocation4 + $0x1], 0 }
   0x2   :  { %13 = vsyncpa [#allocation7], 0 }
   0x3   :  { %14 = vsyncpa [#allocation10], 0 }
   0x4   :  { %15 = vsyncpa [#allocation5], 0 }
   0x5   :  { %17 = vsyncpa [#allocation5 + $0x1], 0  ;;  %s3111_s18 = smov 0   ;;  %s3113_s19 = smov 0  }
   0x6   :  { %s3115_s20 = smov 0   ;;  %s3117_s21 = smov 0  }
   0x7 LB: > { %s3132_s22 = sadd.s32 4294967295, %s3065_s21   ;;  %s2086_s23 = sadd.s32 4294967294, %s3065_s21   ;;  %s3065_s21 = sphi %s3117_s21, %s3558_s21   ;;  %s3061_s20 = sphi %s3115_s20, %s3557_s20   ;;  %s3057_s19 = sphi %s3113_s19, %s3556_s19   ;;  %s3053_s18 = sphi %s3111_s18, %s3555_s18  }
   0x8   : > { %p43_p0 = scmp.ne.s32.totalorder %s3057_s19, %s3053_s18  ;;  %p3536_p1 = scmp.eq.s32.totalorder %s3132_s22, 0 }
   0x9   : > { %p157_p3 = scmp.eq.s32.totalorder %s2086_s23, 1  ;;  %p2087_p5 = scmp.ge.s32.totalorder %s3065_s21, 1 }
   0xa   : > { %p3141_p4 = por %p3536_p1, %p43_p0  ;;  %p164_p7 = scmp.lt.s32.totalorder %s3065_s21, 3 }
   0xb   : > { %p3146_p6 = por %p157_p3, %p43_p0  ;;  %s3067_s27 = smov [#allocation6]  }
   0xc   : > { %s3539_s24 = scalar_select %p3141_p4, 1, 0 }
   0xd   : > { %s3540_s25 = scalar_select %p3146_p6, 1, 0 }
   0xe   : > { %p3151_p8 = pnand %p2087_p5, %p164_p7  ;;  %s176_s28 = sshll.u32 %s3067_s27, 4  ;;  %s3155_s28 = int_to_ptr.vmem [resolvable:$true] %s176_s28 }
   0xf   : > { %s3068_s30 = smov [#allocation9]   ;;  %s3069_s7 = smov [#allocation8]  }
  0x10   : > { %s3541_s26 = scalar_select %p3151_p8, 1, 0 }
  0x11   : > { %p2770_p9 = pneg %p3151_p8  ;;  %s200_s6 = sshll.u32 %s3068_s30, 4  ;;  %s3166_s6 = int_to_ptr.vmem [resolvable:$true] %s200_s6 }
  0x12   : > { %s3168_s8 = sshll.u32 %s3069_s7, 4  ;;  %s2849_s11 = scalar_lea.hbm %s3531_s1, 5120  ;;  %s191_s8 = int_to_ptr.vmem [resolvable:$true] %s3168_s8 }
  0x13   : > { %p3162_p11 = pnand %p2770_p9, %p3536_p1  ;;  %p2850_p12 = scmp.ne.s32.totalorder %s3531_s1, %s2849_s11 }
  0x14   : > { %p2856_p5 = scmp.lt.u32.totalorder %s2849_s11, %s3531_s1 }
  0x15   : > { %p3178_p13 = pneg %p3162_p11 }
  0x17   : > { %p2852_p0 = pnand %p3178_p13, %p2850_p12 }
  0x19   : > { %p2853_p3 = pneg %p2852_p0 }
  0x1b   : > { %p2858_p7 = pnand %p2856_p5, %p2853_p3 }
  0x1d   : > { %2861 = shalt.err (!%p2858_p7)
}
  0x1e   : > { %s2862_s17 = scalar_lea.vmem %s3155_s28, 5120  ;;  %p2870_p2 = scmp.lt.s32.totalorder %s3155_s28, %s3155_s28 }
  0x1f   : > { %p2863_p9 = scmp.ne.s32.totalorder %s3155_s28, %s2862_s17  ;;  %p2871_p6 = scmp.lt.s32.totalorder %s2862_s17, %s2862_s17 }
  0x21   : > { %p2865_p10 = pnand %p2863_p9, %p3178_p13  ;;  %p2872_p12 = por %p2871_p6, %p2870_p2 }
  0x23   : > { %p2866_p1 = pneg %p2865_p10 }
  0x25   : > { %p2873_p0 = pnand %p2872_p12, %p2866_p1 }
  0x27   : > { %2876 = shalt.err (!%p2873_p0)
}
  0x28   : > { %s3070_s23 = smov 256   ;;  %s3071_s27 = smov 16  }
  0x29   : > { %2773 = dma.hbm_to_vmem [thread:$0]  (!%p3162_p11), %s3531_s1, 5120, %s3155_s28, [#allocation7], %s3070_s23, %s3070_s23, %s3071_s27  }
  0x2a   : > { %s2877_s11 = scalar_lea.hbm %s3533_s3, 73728 }
  0x2b   : > { %p2878_p2 = scmp.ne.s32.totalorder %s3533_s3, %s2877_s11  ;;  %p2884_p10 = scmp.lt.u32.totalorder %s2877_s11, %s3533_s3 }
  0x2d   : > { %p2880_p1 = pnand %p2878_p2, %p3178_p13 }
  0x2f   : > { %p2881_p6 = pneg %p2880_p1 }
  0x31   : > { %p2886_p3 = pnand %p2884_p10, %p2881_p6 }
  0x33   : > { %2889 = shalt.err (!%p2886_p3)
}
  0x34   : > { %s2890_s28 = scalar_lea.vmem %s3166_s6, 73728  ;;  %p2898_p12 = scmp.lt.s32.totalorder %s3166_s6, %s3166_s6 }
  0x35   : > { %p2891_p5 = scmp.ne.s32.totalorder %s3166_s6, %s2890_s28  ;;  %p2899_p0 = scmp.lt.s32.totalorder %s2890_s28, %s2890_s28 }
  0x37   : > { %p2893_p7 = pnand %p2891_p5, %p3178_p13  ;;  %p2900_p2 = por %p2899_p0, %p2898_p12 }
  0x39   : > { %p2894_p9 = pneg %p2893_p7 }
  0x3b   : > { %p2901_p1 = pnand %p2900_p2, %p2894_p9 }
  0x3d   : > { %2904 = shalt.err (!%p2901_p1)
}
  0x3e   : > { %2779 = dma.hbm_to_vmem [thread:$0]  (!%p3162_p11), %s3533_s3, 73728, %s3166_s6, [#allocation10], %s3070_s23, %s3070_s23, %s3071_s27  }
  0x3f   : > { %s2905_s10 = scalar_lea.hbm %s3532_s2, 32 }
  0x40   : > { %p2906_p6 = scmp.ne.s32.totalorder %s3532_s2, %s2905_s10  ;;  %p2912_p5 = scmp.lt.u32.totalorder %s2905_s10, %s3532_s2 }
  0x42   : > { %p2908_p10 = pnand %p2906_p6, %p3178_p13 }
  0x44   : > { %p2909_p3 = pneg %p2908_p10 }
  0x46   : > { %p2914_p7 = pnand %p2912_p5, %p2909_p3 }
  0x48   : > { %2917 = shalt.err (!%p2914_p7)
}
  0x49   : > { %s2918_s16 = scalar_lea.vmem %s191_s8, 32  ;;  %p2926_p2 = scmp.lt.s32.totalorder %s191_s8, %s191_s8 }
  0x4a   : > { %p2919_p9 = scmp.ne.s32.totalorder %s191_s8, %s2918_s16  ;;  %p2927_p1 = scmp.lt.s32.totalorder %s2918_s16, %s2918_s16 }
  0x4c   : > { %p2921_p12 = pnand %p2919_p9, %p3178_p13  ;;  %p2928_p4 = por %p2927_p1, %p2926_p2 }
  0x4e   : > { %p2922_p0 = pneg %p2921_p12 }
  0x50   : > { %p2929_p8 = pnand %p2928_p4, %p2922_p0 }
  0x52   : > { %2932 = shalt.err (!%p2929_p8)
}
  0x53   : > { %2776 = dma.hbm_to_vmem [thread:$0]  (!%p3162_p11), %s3532_s2, 32, %s191_s8, [#allocation7]  }
  0x54   : > { %s3072_s27 = smov [#allocation11]   ;;  %s2933_s7 = scalar_lea.hbm %s3534_s4, 32 }
  0x55   : > { %s214_s28 = sshll.u32 %s3072_s27, 4  ;;  %p2934_p6 = scmp.ne.s32.totalorder %s3534_s4, %s2933_s7  ;;  %s215_s28 = int_to_ptr.vmem [resolvable:$true] %s214_s28 }
  0x56   : > { %p2940_p10 = scmp.lt.u32.totalorder %s2933_s7, %s3534_s4 }
  0x57   : > { %p2936_p4 = pnand %p2934_p6, %p3178_p13 }
  0x59   : > { %p2937_p8 = pneg %p2936_p4 }
  0x5b   : > { %p2942_p3 = pnand %p2940_p10, %p2937_p8 }
  0x5d   : > { %2945 = shalt.err (!%p2942_p3)
}
  0x5e   : > { %s2946_s8 = scalar_lea.vmem %s215_s28, 32  ;;  %p2954_p12 = scmp.lt.s32.totalorder %s215_s28, %s215_s28 }
  0x5f   : > { %p2947_p5 = scmp.ne.s32.totalorder %s215_s28, %s2946_s8  ;;  %p2955_p0 = scmp.lt.s32.totalorder %s2946_s8, %s2946_s8 }
  0x61   : > { %p2949_p7 = pnand %p2947_p5, %p3178_p13  ;;  %p2956_p2 = por %p2955_p0, %p2954_p12 }
  0x63   : > { %p2950_p9 = pneg %p2949_p7 }
  0x65   : > { %p2957_p1 = pnand %p2956_p2, %p2950_p9 }
  0x67   : > { %2960 = shalt.err (!%p2957_p1)
}
  0x68   : > { %2782 = dma.hbm_to_vmem [thread:$0]  (!%p3162_p11), %s3534_s4, 32, %s215_s28, [#allocation10]  }
  0x69   : > { %s3260_s14 = sadd.s32 1, %s3065_s21   ;;  %s30_s16 = sadd.s32 1, %s3061_s20 }
  0x6a   : > { %s27_s29 = ssub.s32 %s3065_s21, %s3260_s14  ;;  %p37_p13 = scmp.ne.s32.totalorder %s3061_s20, %s3057_s19 }
  0x6b   : > { %p28_p6 = scmp.eq.s32.totalorder %s27_s29, 0  ;;  %p38_p4 = scmp.eq.s32.totalorder %s3065_s21, 0 }
  0x6c   : > { %p3544_p8 = scmp.eq.s32.totalorder %s3132_s22, 1  ;;  %p2795_p3 = scmp.lt.s32.totalorder %s3065_s21, 2 }
  0x6d   : > { %s3276_s23 = scalar_select %p28_p6, %s3061_s20, %s30_s16  }
  0x6e   : > { %p3270_p10 = por %p3544_p8, %p37_p13  ;;  %p39_p5 = por %p38_p4, %p37_p13 }
  0x6f   : > { %s225_s27 = sand.u32 1, %s3061_s20   ;;  %s2116_s28 = sshll.u32 %s3065_s21, 7 }
  0x70   : > { %s2093_s17 = sshll.u32 %s225_s27, 3  ;;  %s3283_s9 = scalar_lea.hbm %s3530_s0, %s2116_s28 }
  0x71   : > { %s229_s10 = scalar_lea.vmem [#allocation3], %s2093_s17  ;;  %p3287_p11 = pnand %p2795_p3, %p39_p5 }
  0x72   : > { %s236_s11 = sshll.u32 %s229_s10, 4  ;;  %s3291_s8 = scalar_lea.sflag [#allocation4], %s225_s27  ;;  %s3285_s11 = int_to_ptr.vmem [resolvable:$true] %s236_s11 }
  0x73   : > { %s2961_s13 = scalar_lea.hbm %s3283_s9, 128  ;;  %p2963_p9 = pneg %p3287_p11 }
  0x74   : > { %p2962_p7 = scmp.ne.s32.totalorder %s3283_s9, %s2961_s13  ;;  %s2966_s29 = scalar_lea.hbm %s3530_s0, 256 }
  0x75   : > { %p2967_p2 = scmp.lt.u32.totalorder %s3283_s9, %s3530_s0  ;;  %p2968_p1 = scmp.lt.u32.totalorder %s2966_s29, %s2961_s13 }
  0x76   : > { %p2964_p12 = pnand %p2963_p9, %p2962_p7  ;;  %p2970_p6 = scmp.lt.u32.totalorder %s2961_s13, %s3283_s9 }
  0x77   : > { %p2969_p13 = por %p2968_p1, %p2967_p2 }
  0x78   : > { %p2965_p0 = pneg %p2964_p12 }
  0x79   : > { %p2971_p4 = por %p2970_p6, %p2969_p13 }
  0x7b   : > { %p2972_p8 = pnand %p2971_p4, %p2965_p0 }
  0x7d   : > { %2975 = shalt.err (!%p2972_p8)
}
  0x7e   : > { %s2976_s27 = scalar_lea.vmem %s3285_s11, 128  ;;  %s3073_s30 = smov [#allocation3]  }
  0x7f   : > { %p2977_p3 = scmp.ne.s32.totalorder %s3285_s11, %s2976_s27  ;;  %s2981_s7 = sshll.u32 %s3073_s30, 4  ;;  %s2982_s7 = int_to_ptr.vmem [resolvable:$false] %s2981_s7 }
  0x80   : > { %s2983_s10 = scalar_lea.vmem %s2982_s7, 256  ;;  %p2984_p12 = scmp.lt.s32.totalorder %s3285_s11, %s2982_s7 }
  0x81   : > { %p2979_p5 = pnand %p2977_p3, %p2963_p9  ;;  %p2985_p2 = scmp.lt.s32.totalorder %s2983_s10, %s2976_s27 }
  0x83   : > { %p2980_p7 = pneg %p2979_p5  ;;  %p2986_p1 = por %p2985_p2, %p2984_p12 }
  0x85   : > { %p2987_p13 = pnand %p2986_p1, %p2980_p7 }
  0x87   : > { %2990 = shalt.err (!%p2987_p13)
}
  0x88   : > { %s3074_s13 = smov 64   ;;  %s3075_s15 = smov 4  }
  0x89   : > { %2786 = dma.hbm_to_vmem [thread:$0]  (!%p3287_p11), %s3283_s9, 128, %s3285_s11, %s3291_s8, %s3074_s13, %s3074_s13, %s3075_s15  }
  0x8a   : > { %p3547_p9 = scmp.ne.s32.totalorder %s3541_s26, 0 }
  0x8b   : > { %s3322_s16 = sand.u32 (!%p3547_p9), 1, %s3057_s19   ;;  %p3548_p0 = scmp.ne.s32.totalorder (!%p3547_p9), %s3539_s24, 0 }
  0x8c   : > { %248 = sbr.rel (%p3547_p9) target bundleno = 939 (0x3ab), region = 40  ;;  %s2097_s29 = sshll.u32 (!%p3547_p9), %s3322_s16, 3 }
  0x8d   : > { %s251_s17 = scalar_lea.sflag (!%p3547_p9), [#allocation4], %s3322_s16  ;;  %s3328_s28 = scalar_lea.vmem (!%p3547_p9), [#allocation3], %s2097_s29 }
  0x93   : > { %3036 = dma.done.wait (%p3548_p0), %s251_s17, 128  }
  0x94   : > { %3038 = vsyncadd (%p3548_p0), %s251_s17, 4294967168  ;;  %p3549_p11 = scmp.eq.s32.totalorder %s3132_s22, 0 }
  0x96   : > { %3040 = dma.done.wait (%p3549_p11), [#allocation7], 5152   ;;  %p3550_p6 = pmov %p3549_p11 }
  0x98   : > { %3042 = vsyncadd (%p3550_p6), [#allocation7], 4294962144  ;;  %p3551_p4 = pmov %p3550_p6 }
  0x9a   : > { %3044 = dma.done.wait (%p3551_p4), [#allocation10], 73760   ;;  %p3552_p8 = pmov %p3551_p4 }
  0x9b   : > { %v300_v0 = vld [vmem:[#allocation6 + $0x8] sm:$0xff]  ;;  %v302_v1 = vld [vmem:[#allocation6 + $0x18] sm:$0xff]  ;;  %v299_v2 = vld [vmem:[#allocation6] sm:$0xff]  ;;  %v341_v14 = vlaneseq  ;;  %v3076_v15 = vmov 1983009808   ;;  %vm363_vm0 = vcmask 261120  }
  0x9c   : > { %3046 = vsyncadd (%p3552_p8), [#allocation10], 4294893536  ;;  %v2118_v3 = vpack.c.bf16 %v302_v1, %v300_v0  ;;  %v301_v4 = vld [vmem:[#allocation6 + $0x10] sm:$0xff]  ;;  %v304_v5 = vld [vmem:[#allocation6 + $0x28] sm:$0xff]  ;;  %v355_v16 = vunpack.c.l.s4 %v3076_v15  ;;  %s296_s24 = scalar_lea.vmem [#allocation12], %s2097_s29  ;;  %s2117_s9 = sshll.u32 %s3132_s22, 7 }
  0x9d   : > { %v306_v6 = vld [vmem:[#allocation6 + $0x38] sm:$0xff]  ;;  %v2120_v7 = vpack.c.bf16 %v301_v4, %v299_v2  ;;  %v303_v9 = vld [vmem:[#allocation6 + $0x20] sm:$0xff]  ;;  %v305_v10 = vld [vmem:[#allocation6 + $0x30] sm:$0xff]  ;;  %v3343_v23 = vshrl.u32 %v341_v14, 7  ;;  %vm454_vm1 = vcmp.lt.s32.totalorder %v341_v14, 256  ;;  %s1972_s26 = sshll.u32 %s296_s24, 4  ;;  %s3486_s8 = scalar_lea.hbm %s3535_s5, %s2117_s9  ;;  %s3481_s26 = int_to_ptr.vmem [resolvable:$true] %s1972_s26 }
  0x9e   : > { %v2122_v8 = vpack.c.bf16 %v306_v6, %v304_v5  ;;  %v308_v11 = vld [vmem:[#allocation6 + $0x48] sm:$0xff]  ;;  %2119 = vmatprep.subr.bf16.mxu0 %v2118_v3  ;;  %v310_v12 = vld [vmem:[#allocation6 + $0x58] sm:$0xff]  ;;  %v2124_v13 = vpack.c.bf16 %v305_v10, %v303_v9  ;;  %v307_v18 = vld [vmem:[#allocation6 + $0x40] sm:$0xff]  ;;  %v356_v24 = vunpack.c.0.s8 %v355_v16  ;;  %s1959_s27 = scalar_lea.sflag [#allocation5], %s3322_s16  ;;  %s2991_s30 = scalar_lea.vmem %s3481_s26, 128 }
  0x9f   : > { %2121 = vmatpush1.bf16.msra.mxu0 %v2120_v7  ;;  %v2126_v17 = vpack.c.bf16 %v310_v12, %v308_v11  ;;  %v309_v19 = vld [vmem:[#allocation6 + $0x50] sm:$0xff]  ;;  %v312_v20 = vld [vmem:[#allocation6 + $0x68] sm:$0xff]  ;;  %v314_v21 = vld [vmem:[#allocation6 + $0x78] sm:$0xff]  ;;  %p2992_p3 = scmp.ne.s32.totalorder %s3481_s26, %s2991_s30  ;;  %s3078_s22 = smov [#allocation12]  }
  0xa0   : > { %2123 = vmatprep.subr.bf16.mxu0 %v2122_v8  ;;  %v2128_v22 = vpack.c.bf16 %v309_v19, %v307_v18  ;;  %v2130_v25 = vpack.c.bf16 %v314_v21, %v312_v20  ;;  %v311_v26 = vld [vmem:[#allocation6 + $0x60] sm:$0xff]  ;;  %v313_v27 = vld [vmem:[#allocation6 + $0x70] sm:$0xff]  ;;  %v316_v28 = vld [vmem:[#allocation6 + $0x88] sm:$0xff]  ;;  %v3346_v32 = vsub.s32 %v356_v24, %v3343_v23  ;;  %s2995_s7 = sshll.u32 %s3078_s22, 4  ;;  %s2996_s7 = int_to_ptr.vmem [resolvable:$false] %s2995_s7 }
  0xa1   : > { %v318_v29 = vld [vmem:[#allocation6 + $0x98] sm:$0xff]  ;;  %v2132_v30 = vpack.c.bf16 %v313_v27, %v311_v26  ;;  %v315_v31 = vld [vmem:[#allocation6 + $0x80] sm:$0xff]  ;;  %v317_v34 = vld [vmem:[#allocation6 + $0x90] sm:$0xff]  ;;  %p2993_p5 = pnand %p2992_p3, %p3270_p10  ;;  %s2997_s10 = scalar_lea.vmem %s2996_s7, 256 }
  0xa2   : > { %v2134_v33 = vpack.c.bf16 %v318_v29, %v316_v28  ;;  %v320_v35 = vld [vmem:[#allocation6 + $0xa8] sm:$0xff]  ;;  %v322_v36 = vld [vmem:[#allocation6 + $0xb8] sm:$0xff]  ;;  %v2136_v40 = vpack.c.bf16 %v317_v34, %v315_v31  ;;  %v319_v45 = vld [vmem:[#allocation6 + $0xa0] sm:$0xff]  ;;  %p2998_p12 = scmp.lt.s32.totalorder %s3481_s26, %s2996_s7  ;;  %p2999_p2 = scmp.lt.s32.totalorder %s2997_s10, %s2991_s30 }
  0xa3   : > { %2125 = vmatpush1.bf16.msra.mxu0 %v2124_v13  ;;  %v3349_v37 = vld.sshfl [vmem:[%s3328_s28] sm:$0xff pattern:$0x76325410]  ;;  %v625_v42 = vld [vmem:[#allocation9 + $0x200] sm:$0xff]  ;;  %v2138_v44 = vpack.c.bf16 %v322_v36, %v320_v35  ;;  %p2994_p7 = pneg %p2993_p5 }
  0xa4   : > { %2127 = vmatprep.subr.bf16.mxu0 %v2126_v17  ;;  %v626_v38 = vld [vmem:[#allocation9 + $0x208] sm:$0xff]  ;;  %v628_v39 = vld [vmem:[#allocation9 + $0x218] sm:$0xff]  ;;  %v627_v43 = vld [vmem:[#allocation9 + $0x210] sm:$0xff]  ;;  %v361_v51 = vcombine.high %v3349_v37, %v3349_v37  ;;  %p3000_p1 = por %p2999_p2, %p2998_p12 }
  0xa5   : > { %v2414_v41 = vpack.c.bf16 %v628_v39, %v626_v38  ;;  %v321_v46 = vld [vmem:[#allocation6 + $0xb0] sm:$0xff]  ;;  %v2416_v47 = vpack.c.bf16 %v627_v43, %v625_v42  ;;  %v324_v49 = vld [vmem:[#allocation6 + $0xc8] sm:$0xff]  ;;  %v326_v50 = vld [vmem:[#allocation6 + $0xd8] sm:$0xff] }
  0xa6   : > { %v630_v48 = vld [vmem:[#allocation9 + $0x228] sm:$0xff]  ;;  %v632_v52 = vld [vmem:[#allocation9 + $0x238] sm:$0xff]  ;;  %v629_v54 = vld [vmem:[#allocation9 + $0x220] sm:$0xff]  ;;  %v2140_v56 = vpack.c.bf16 %v321_v46, %v319_v45  ;;  %2103 = vmatprep.mubr.msk.f32.mxu0 %vm363_vm0, %v361_v51  ;;  %v2142_v60 = vpack.c.bf16 %v326_v50, %v324_v49  ;;  %p3001_p13 = pnand %p3000_p1, %p2994_p7 }
  0xa7   : > { %2129 = vmatpush1.bf16.msra.mxu0 %v2128_v22  ;;  %2415 = vmatprep.subr.bf16.mxu1 %v2414_v41  ;;  %v2418_v53 = vpack.c.bf16 %v632_v52, %v630_v48  ;;  %v631_v55 = vld [vmem:[#allocation9 + $0x230] sm:$0xff]  ;;  %v634_v58 = vld [vmem:[#allocation9 + $0x248] sm:$0xff]  ;;  %v636_v59 = vld [vmem:[#allocation9 + $0x258] sm:$0xff] }
  0xa8   : > { %2131 = vmatprep.subr.bf16.mxu0 %v2130_v25  ;;  %2417 = vmatpush1.bf16.msra.mxu1 %v2416_v47  ;;  %v2420_v57 = vpack.c.bf16 %v631_v55, %v629_v54  ;;  %v323_v61 = vld [vmem:[#allocation6 + $0xc0] sm:$0xff]  ;;  %v325_v62 = vld [vmem:[#allocation6 + $0xd0] sm:$0xff]  ;;  %v2422_v63 = vpack.c.bf16 %v636_v59, %v634_v58  ;;  %v328_v1 = vld [vmem:[#allocation6 + $0xe8] sm:$0xff] }
  0xa9   : > { %2419 = vmatprep.subr.bf16.mxu1 %v2418_v53  ;;  %v633_v0 = vld [vmem:[#allocation9 + $0x240] sm:$0xff]  ;;  %v330_v2 = vld [vmem:[#allocation6 + $0xf8] sm:$0xff]  ;;  %v638_v5 = vld [vmem:[#allocation9 + $0x268] sm:$0xff]  ;;  %v2144_v7 = vpack.c.bf16 %v325_v62, %v323_v61 }
  0xaa   : > { %v635_v3 = vld [vmem:[#allocation9 + $0x250] sm:$0xff]  ;;  %v640_v6 = vld [vmem:[#allocation9 + $0x278] sm:$0xff]  ;;  %v637_v9 = vld [vmem:[#allocation9 + $0x260] sm:$0xff]  ;;  %v2146_v11 = vpack.c.bf16 %v330_v2, %v328_v1 }
  0xab   : > { %2133 = vmatpush1.bf16.msra.mxu0 %v2132_v30  ;;  %v2424_v4 = vpack.c.bf16 %v635_v3, %v633_v0  ;;  %v2426_v8 = vpack.c.bf16 %v640_v6, %v638_v5  ;;  %v639_v10 = vld [vmem:[#allocation9 + $0x270] sm:$0xff]  ;;  %v327_v12 = vld [vmem:[#allocation6 + $0xe0] sm:$0xff]  ;;  %v642_v15 = vld [vmem:[#allocation9 + $0x288] sm:$0xff] }
  0xac   : > { %2135 = vmatprep.subr.bf16.mxu0 %v2134_v33  ;;  %2421 = vmatpush1.bf16.msra.mxu1 %v2420_v57  ;;  %v329_v13 = vld [vmem:[#allocation6 + $0xf0] sm:$0xff]  ;;  %v332_v16 = vld [vmem:[#allocation6 + $0x108] sm:$0xff]  ;;  %v334_v17 = vld [vmem:[#allocation6 + $0x118] sm:$0xff]  ;;  %v2428_v19 = vpack.c.bf16 %v639_v10, %v637_v9 }
  0xad   : > { %2423 = vmatprep.subr.bf16.mxu1 %v2422_v63  ;;  %v644_v18 = vld [vmem:[#allocation9 + $0x298] sm:$0xff]  ;;  %v2148_v20 = vpack.c.bf16 %v329_v13, %v327_v12  ;;  %v641_v24 = vld [vmem:[#allocation9 + $0x280] sm:$0xff]  ;;  %v643_v25 = vld [vmem:[#allocation9 + $0x290] sm:$0xff]  ;;  %v2150_v26 = vpack.c.bf16 %v334_v17, %v332_v16 }
  0xae   : > { %v331_v21 = vld [vmem:[#allocation6 + $0x100] sm:$0xff]  ;;  %v2430_v22 = vpack.c.bf16 %v644_v18, %v642_v15  ;;  %v333_v27 = vld [vmem:[#allocation6 + $0x110] sm:$0xff]  ;;  %v336_v30 = vld [vmem:[#allocation6 + $0x128] sm:$0xff]  ;;  %v2432_v33 = vpack.c.bf16 %v643_v25, %v641_v24 }
  0xaf   : > { %2137 = vmatpush1.bf16.msra.mxu0 %v2136_v40  ;;  %v646_v28 = vld [vmem:[#allocation9 + $0x2a8] sm:$0xff]  ;;  %v648_v29 = vld [vmem:[#allocation9 + $0x2b8] sm:$0xff]  ;;  %v2152_v34 = vpack.c.bf16 %v333_v27, %v331_v21  ;;  %v645_v38 = vld [vmem:[#allocation9 + $0x2a0] sm:$0xff] }
  0xb0   : > { %2139 = vmatprep.subr.bf16.mxu0 %v2138_v44  ;;  %2425 = vmatpush1.bf16.msra.mxu1 %v2424_v4  ;;  %v338_v31 = vld [vmem:[#allocation6 + $0x138] sm:$0xff]  ;;  %v335_v35 = vld [vmem:[#allocation6 + $0x120] sm:$0xff]  ;;  %v2434_v36 = vpack.c.bf16 %v648_v29, %v646_v28  ;;  %v337_v41 = vld [vmem:[#allocation6 + $0x130] sm:$0xff] }
  0xb1   : > { %2427 = vmatprep.subr.bf16.mxu1 %v2426_v8  ;;  %v647_v39 = vld [vmem:[#allocation9 + $0x2b0] sm:$0xff]  ;;  %v2154_v40 = vpack.c.bf16 %v338_v31, %v336_v30  ;;  %v650_v42 = vld [vmem:[#allocation9 + $0x2c8] sm:$0xff]  ;;  %v652_v43 = vld [vmem:[#allocation9 + $0x2d8] sm:$0xff]  ;;  %v2156_v47 = vpack.c.bf16 %v337_v41, %v335_v35 }
  0xb2   : > { %v780_v44 = vld [vmem:[#allocation9 + $0x608] sm:$0xff]  ;;  %v782_v45 = vld [vmem:[#allocation9 + $0x618] sm:$0xff]  ;;  %v2436_v46 = vpack.c.bf16 %v647_v39, %v645_v38  ;;  %v779_v48 = vld [vmem:[#allocation9 + $0x600] sm:$0xff]  ;;  %v2438_v49 = vpack.c.bf16 %v652_v43, %v650_v42 }
  0xb3   : > { %2141 = vmatpush1.bf16.msra.mxu0 %v2140_v56  ;;  %v649_v50 = vld [vmem:[#allocation9 + $0x2c0] sm:$0xff]  ;;  %v651_v51 = vld [vmem:[#allocation9 + $0x2d0] sm:$0xff]  ;;  %v2158_v52 = vpack.c.bf16 %v782_v45, %v780_v44  ;;  %v654_v54 = vld [vmem:[#allocation9 + $0x2e8] sm:$0xff] }
  0xb4   : > { %2143 = vmatprep.subr.bf16.mxu0 %v2142_v60  ;;  %2429 = vmatpush1.bf16.msra.mxu1 %v2428_v19  ;;  %v781_v53 = vld [vmem:[#allocation9 + $0x610] sm:$0xff]  ;;  %v656_v55 = vld [vmem:[#allocation9 + $0x2f8] sm:$0xff]  ;;  %v784_v56 = vld [vmem:[#allocation9 + $0x628] sm:$0xff]  ;;  %v2440_v58 = vpack.c.bf16 %v651_v51, %v649_v50 }
  0xb5   : > { %2431 = vmatprep.subr.bf16.mxu1 %v2430_v22  ;;  %v786_v57 = vld [vmem:[#allocation9 + $0x638] sm:$0xff]  ;;  %v2160_v59 = vpack.c.bf16 %v781_v53, %v779_v48  ;;  %v2442_v60 = vpack.c.bf16 %v656_v55, %v654_v54  ;;  %v653_v61 = vld [vmem:[#allocation9 + $0x2e0] sm:$0xff]  ;;  %v655_v62 = vld [vmem:[#allocation9 + $0x2f0] sm:$0xff] }
  0xb6   : > { %v2162_v63 = vpack.c.bf16 %v786_v57, %v784_v56  ;;  %v783_v0 = vld [vmem:[#allocation9 + $0x620] sm:$0xff]  ;;  %v785_v1 = vld [vmem:[#allocation9 + $0x630] sm:$0xff]  ;;  %v788_v2 = vld [vmem:[#allocation9 + $0x648] sm:$0xff]  ;;  %v2444_v4 = vpack.c.bf16 %v655_v62, %v653_v61 }
  0xb7   : > { %2145 = vmatpush1.bf16.msra.mxu0 %v2144_v7  ;;  %v790_v3 = vld [vmem:[#allocation9 + $0x658] sm:$0xff]  ;;  %v2164_v5 = vpack.c.bf16 %v785_v1, %v783_v0  ;;  %v787_v7 = vld [vmem:[#allocation9 + $0x640] sm:$0xff]  ;;  %v789_v8 = vld [vmem:[#allocation9 + $0x650] sm:$0xff] }
  0xb8   : > { %2147 = vmatprep.subr.bf16.mxu0 %v2146_v11  ;;  %2433 = vmatpush1.bf16.msra.mxu1 %v2432_v33  ;;  %v2166_v6 = vpack.c.bf16 %v790_v3, %v788_v2  ;;  %v792_v9 = vld [vmem:[#allocation9 + $0x668] sm:$0xff]  ;;  %v794_v10 = vld [vmem:[#allocation9 + $0x678] sm:$0xff]  ;;  %v2168_v11 = vpack.c.bf16 %v789_v8, %v787_v7  ;;  %v791_v13 = vld [vmem:[#allocation9 + $0x660] sm:$0xff] }
  0xb9   : > { %2435 = vmatprep.subr.bf16.mxu1 %v2434_v36  ;;  %v2170_v12 = vpack.c.bf16 %v794_v10, %v792_v9  ;;  %v793_v15 = vld [vmem:[#allocation9 + $0x670] sm:$0xff]  ;;  %v796_v16 = vld [vmem:[#allocation9 + $0x688] sm:$0xff]  ;;  %v795_v19 = vld [vmem:[#allocation9 + $0x680] sm:$0xff] }
  0xba   : > { %v2172_v17 = vpack.c.bf16 %v793_v15, %v791_v13  ;;  %v800_v21 = vld [vmem:[#allocation9 + $0x6a8] sm:$0xff]  ;;  %v802_v22 = vld [vmem:[#allocation9 + $0x6b8] sm:$0xff]  ;;  %v801_v27 = vld [vmem:[#allocation9 + $0x6b0] sm:$0xff] }
  0xbb   : > { %2149 = vmatpush1.bf16.msra.mxu0 %v2148_v20  ;;  %v797_v20 = vld [vmem:[#allocation9 + $0x690] sm:$0xff]  ;;  %v2178_v25 = vpack.c.bf16 %v802_v22, %v800_v21  ;;  %v804_v28 = vld [vmem:[#allocation9 + $0x6c8] sm:$0xff]  ;;  %v806_v29 = vld [vmem:[#allocation9 + $0x6d8] sm:$0xff]  ;;  %v3077_v22 = vmov 0.0  }
  0xbc   : > { %2151 = vmatprep.subr.bf16.mxu0 %v2150_v26  ;;  %2437 = vmatpush1.bf16.msra.mxu1 %v2436_v46  ;;  %v2176_v24 = vpack.c.bf16 %v797_v20, %v795_v19  ;;  %v799_v26 = vld [vmem:[#allocation9 + $0x6a0] sm:$0xff]  ;;  %v2182_v31 = vpack.c.bf16 %v806_v29, %v804_v28  ;;  %v808_v35 = vld [vmem:[#allocation9 + $0x6e8] sm:$0xff]  ;;  %v810_v36 = vld [vmem:[#allocation9 + $0x6f8] sm:$0xff]  ;;  %456 = vst.msk [vmem:[#allocation2 + $0x8] ss:$4 sm:$0x3] %vm454_vm1, %v3077_v22 }
  0xbd   : > { %2439 = vmatprep.subr.bf16.mxu1 %v2438_v49  ;;  %v2180_v30 = vpack.c.bf16 %v801_v27, %v799_v26  ;;  %v803_v33 = vld [vmem:[#allocation9 + $0x6c0] sm:$0xff]  ;;  %v2186_v39 = vpack.c.bf16 %v810_v36, %v808_v35  ;;  %v809_v41 = vld [vmem:[#allocation9 + $0x6f0] sm:$0xff]  ;;  %v812_v43 = vld [vmem:[#allocation9 + $0x708] sm:$0xff]  ;;  %458 = vst.msk [vmem:[#allocation2 + $0x10] ss:$4 sm:$0x3] %vm454_vm1, %v3077_v22 }
  0xbe   : > { %v814_v44 = vld [vmem:[#allocation9 + $0x718] sm:$0xff]  ;;  %v658_v45 = vld [vmem:[#allocation9 + $0x308] sm:$0xff]  ;;  %v811_v48 = vld [vmem:[#allocation9 + $0x700] sm:$0xff]  ;;  %460 = vst.msk [vmem:[#allocation2 + $0xb] ss:$4 sm:$0x3] %vm454_vm1, %v3077_v22 }
  0xbf   : > { %2153 = vmatpush1.bf16.msra.mxu0 %v2152_v34  ;;  %v805_v34 = vld [vmem:[#allocation9 + $0x6d0] sm:$0xff]  ;;  %v2190_v46 = vpack.c.bf16 %v814_v44, %v812_v43  ;;  %v816_v55 = vld [vmem:[#allocation9 + $0x728] sm:$0xff]  ;;  %v818_v56 = vld [vmem:[#allocation9 + $0x738] sm:$0xff]  ;;  %462 = vst.msk [vmem:[#allocation2 + $0x13] ss:$4 sm:$0x3] %vm454_vm1, %v3077_v22 }
  0xc0   : > { %2155 = vmatprep.subr.bf16.mxu0 %v2154_v40  ;;  %2441 = vmatpush1.bf16.msra.mxu1 %v2440_v58  ;;  %v2184_v38 = vpack.c.bf16 %v805_v34, %v803_v33  ;;  %v807_v40 = vld [vmem:[#allocation9 + $0x6e0] sm:$0xff]  ;;  %v813_v49 = vld [vmem:[#allocation9 + $0x710] sm:$0xff]  ;;  %v662_v57 = vld [vmem:[#allocation9 + $0x328] sm:$0xff]  ;;  %v2194_v58 = vpack.c.bf16 %v818_v56, %v816_v55 }
  0xc1   : > { %2443 = vmatprep.subr.bf16.mxu1 %v2442_v60  ;;  %v2188_v42 = vpack.c.bf16 %v809_v41, %v807_v40  ;;  %v2192_v51 = vpack.c.bf16 %v813_v49, %v811_v48  ;;  %v659_v53 = vld [vmem:[#allocation9 + $0x310] sm:$0xff]  ;;  %v815_v60 = vld [vmem:[#allocation9 + $0x720] sm:$0xff]  ;;  %v820_v3 = vld [vmem:[#allocation9 + $0x748] sm:$0xff] }
  0xc2   : > { %v817_v61 = vld [vmem:[#allocation9 + $0x730] sm:$0xff]  ;;  %v661_v0 = vld [vmem:[#allocation9 + $0x320] sm:$0xff]  ;;  %v668_v7 = vld [vmem:[#allocation9 + $0x358] sm:$0xff] }
  0xc3   : > { %2157 = vmatpush1.bf16.msra.mxu0 %v2156_v47  ;;  %v660_v47 = vld [vmem:[#allocation9 + $0x318] sm:$0xff]  ;;  %v663_v1 = vld [vmem:[#allocation9 + $0x330] sm:$0xff]  ;;  %v819_v8 = vld [vmem:[#allocation9 + $0x740] sm:$0xff] }
  0xc4   : > { %2159 = vmatprep.subr.bf16.mxu0 %v2158_v52  ;;  %2445 = vmatpush1.bf16.msra.mxu1 %v2444_v4  ;;  %v2446_v50 = vpack.c.bf16 %v660_v47, %v658_v45  ;;  %v657_v52 = vld [vmem:[#allocation9 + $0x300] sm:$0xff]  ;;  %v2452_v2 = vpack.c.bf16 %v663_v1, %v661_v0  ;;  %v822_v4 = vld [vmem:[#allocation9 + $0x758] sm:$0xff]  ;;  %v821_v9 = vld [vmem:[#allocation9 + $0x750] sm:$0xff]  ;;  %v491_v0 = vcombine.high %v3077_v22, %v3077_v22 }
  0xc5   : > { %v2448_v54 = vpack.c.bf16 %v659_v53, %v657_v52  ;;  %v667_v13 = vld [vmem:[#allocation9 + $0x350] sm:$0xff]  ;;  %v672_v19 = vld [vmem:[#allocation9 + $0x378] sm:$0xff]  ;;  %v823_v20 = vld [vmem:[#allocation9 + $0x760] sm:$0xff] }
  0xc6   : > { %431 = vmatmul.mubr.f32.vlgmr.msra.gmra.mrb[0].mxu0 %v3349_v37  ;;  %v798_v37 = vld [vmem:[#allocation9 + $0x698] sm:$0xff]  ;;  %2447 = vmatprep.subr.bf16.mxu1 %v2446_v50  ;;  %v825_v21 = vld [vmem:[#allocation9 + $0x770] sm:$0xff]  ;;  %v669_v26 = vld [vmem:[#allocation9 + $0x360] sm:$0xff] }
  0xc7   : > { %2161 = vmatpush1.bf16.msra.mxu0 %v2160_v59  ;;  %v2174_v18 = vpack.c.bf16 %v798_v37, %v796_v16  ;;  %v664_v59 = vld [vmem:[#allocation9 + $0x338] sm:$0xff]  ;;  %v824_v16 = vld [vmem:[#allocation9 + $0x768] sm:$0xff]  ;;  %v671_v27 = vld [vmem:[#allocation9 + $0x370] sm:$0xff] }
  0xc8   : > { %2163 = vmatprep.subr.bf16.mxu0 %v2162_v63  ;;  %2449 = vmatpush1.bf16.msra.mxu1 %v2448_v54  ;;  %v2450_v62 = vpack.c.bf16 %v664_v59, %v662_v57  ;;  %v2196_v63 = vpack.c.bf16 %v817_v61, %v815_v60  ;;  %v826_v37 = vld [vmem:[#allocation9 + $0x778] sm:$0xff]  ;;  %v2460_v14 = vpack.c.bf16 %v671_v27, %v669_v26  ;;  %v828_v28 = vld [vmem:[#allocation9 + $0x788] sm:$0xff]  ;;  %v827_v34 = vld [vmem:[#allocation9 + $0x780] sm:$0xff] }
  0xc9   : > { %v830_v29 = vld [vmem:[#allocation9 + $0x798] sm:$0xff]  ;;  %v829_v35 = vld [vmem:[#allocation9 + $0x790] sm:$0xff]  ;;  %v832_v41 = vld [vmem:[#allocation9 + $0x7a8] sm:$0xff] }
  0xca   : > { %2451 = vmatprep.subr.bf16.mxu1 %v2450_v62  ;;  %v676_v33 = vld [vmem:[#allocation9 + $0x398] sm:$0xff]  ;;  %v675_v40 = vld [vmem:[#allocation9 + $0x390] sm:$0xff]  ;;  %v678_v44 = vld [vmem:[#allocation9 + $0x3a8] sm:$0xff] }
  0xcb   : > { %2165 = vmatpush1.bf16.msra.mxu0 %v2164_v5  ;;  %v666_v5 = vld [vmem:[#allocation9 + $0x348] sm:$0xff]  ;;  %v834_v43 = vld [vmem:[#allocation9 + $0x7b8] sm:$0xff]  ;;  %v831_v48 = vld [vmem:[#allocation9 + $0x7a0] sm:$0xff] }
  0xcc   : > { %2167 = vmatprep.subr.bf16.mxu0 %v2166_v6  ;;  %2453 = vmatpush1.bf16.msra.mxu1 %v2452_v2  ;;  %v2198_v6 = vpack.c.bf16 %v822_v4, %v820_v3  ;;  %v2454_v10 = vpack.c.bf16 %v668_v7, %v666_v5  ;;  %v680_v45 = vld [vmem:[#allocation9 + $0x3b8] sm:$0xff]  ;;  %v833_v49 = vld [vmem:[#allocation9 + $0x7b0] sm:$0xff]  ;;  %v677_v50 = vld [vmem:[#allocation9 + $0x3a0] sm:$0xff] }
  0xcd   : > { %v2466_v47 = vpack.c.bf16 %v680_v45, %v678_v44  ;;  %v679_v52 = vld [vmem:[#allocation9 + $0x3b0] sm:$0xff]  ;;  %v836_v53 = vld [vmem:[#allocation9 + $0x7c8] sm:$0xff]  ;;  %v838_v54 = vld [vmem:[#allocation9 + $0x7d8] sm:$0xff] }
  0xce   : > { %2455 = vmatprep.subr.bf16.mxu1 %v2454_v10  ;;  %v2468_v55 = vpack.c.bf16 %v679_v52, %v677_v50  ;;  %v2214_v56 = vpack.c.bf16 %v838_v54, %v836_v53  ;;  %v682_v57 = vld [vmem:[#allocation9 + $0x3c8] sm:$0xff]  ;;  %v835_v59 = vld [vmem:[#allocation9 + $0x7c0] sm:$0xff]  ;;  %v837_v61 = vld [vmem:[#allocation9 + $0x7d0] sm:$0xff] }
  0xcf   : > { %2169 = vmatpush1.bf16.msra.mxu0 %v2168_v11  ;;  %v2200_v11 = vpack.c.bf16 %v821_v9, %v819_v8  ;;  %v681_v62 = vld [vmem:[#allocation9 + $0x3c0] sm:$0xff]  ;;  %v840_v1 = vld [vmem:[#allocation9 + $0x7e8] sm:$0xff]  ;;  %v842_v2 = vld [vmem:[#allocation9 + $0x7f8] sm:$0xff]  ;;  %v2216_v4 = vpack.c.bf16 %v837_v61, %v835_v59 }
  0xd0   : > { %2171 = vmatprep.subr.bf16.mxu0 %v2170_v12  ;;  %v665_v12 = vld [vmem:[#allocation9 + $0x340] sm:$0xff]  ;;  %v686_v3 = vld [vmem:[#allocation9 + $0x3e8] sm:$0xff]  ;;  %v688_v5 = vld [vmem:[#allocation9 + $0x3f8] sm:$0xff]  ;;  %v2218_v7 = vpack.c.bf16 %v842_v2, %v840_v1 }
  0xd1   : > { %v2456_v15 = vpack.c.bf16 %v667_v13, %v665_v12  ;;  %v839_v8 = vld [vmem:[#allocation9 + $0x7e0] sm:$0xff]  ;;  %v841_v9 = vld [vmem:[#allocation9 + $0x7f0] sm:$0xff]  ;;  %v2474_v10 = vpack.c.bf16 %v688_v5, %v686_v3  ;;  %v1463_v13 = vcombine.low %v3077_v22, %v491_v0  ;;  %v692_v26 = vld [vmem:[#allocation9 + $0x418] sm:$0xff] }
  0xd2   : > { %v687_v12 = vld [vmem:[#allocation9 + $0x3f0] sm:$0xff]  ;;  %v843_v5 = vld [vmem:[#allocation9 + $0x800] sm:$0xff] }
  0xd3   : > { %2173 = vmatpush1.bf16.msra.mxu0 %v2172_v17  ;;  %v670_v17 = vld [vmem:[#allocation9 + $0x368] sm:$0xff]  ;;  %2457 = vmatpush1.bf16.msra.mxu1 %v2456_v15  ;;  %v2220_v15 = vpack.c.bf16 %v841_v9, %v839_v8 }
  0xd4   : > { %2175 = vmatprep.subr.bf16.mxu0 %v2174_v18  ;;  %v2202_v18 = vpack.c.bf16 %v826_v37, %v824_v16  ;;  %v501_v37 = vrot.slane %v3077_v22, 1 }
  0xd7   : > { %2177 = vmatpush1.bf16.msra.mxu0 %v2176_v24  ;;  %v2458_v24 = vpack.c.bf16 %v672_v19, %v670_v17  ;;  %v502_v17 = vrot.slane %v491_v0, 1  ;;  %v510_v19 = vrot.slane %v491_v0, 2 }
  0xd8   : > { %2179 = vmatprep.subr.bf16.mxu0 %v2178_v25  ;;  %v2204_v25 = vpack.c.bf16 %v825_v21, %v823_v20  ;;  %v844_v20 = vld [vmem:[#allocation9 + $0x808] sm:$0xff]  ;;  %v846_v21 = vld [vmem:[#allocation9 + $0x818] sm:$0xff] }
  0xd9   : > { %2459 = vmatprep.subr.bf16.mxu1 %v2458_v24  ;;  %v690_v24 = vld [vmem:[#allocation9 + $0x408] sm:$0xff]  ;;  %v1464_v27 = vcombine.low %v501_v37, %v502_v17 }
  0xda   : > { %2461 = vmatpush1.bf16.msra.mxu1 %v2460_v14 }
  0xdb   : > { %2181 = vmatpush1.bf16.msra.mxu0 %v2180_v30  ;;  %v674_v30 = vld [vmem:[#allocation9 + $0x388] sm:$0xff] }
  0xdc   : > { %2183 = vmatprep.subr.bf16.mxu0 %v2182_v31  ;;  %v2206_v31 = vpack.c.bf16 %v830_v29, %v828_v28  ;;  %v2462_v36 = vpack.c.bf16 %v676_v33, %v674_v30  ;;  %v2478_v28 = vpack.c.bf16 %v692_v26, %v690_v24  ;;  %v343_v29 = vsub.s32 0, %v3343_v23  ;;  %v339_v30 = vld [vmem:[#allocation8] sm:$0x3]  ;;  %v848_v24 = vld [vmem:[#allocation9 + $0x828] sm:$0xff] }
  0xde   : > { %2463 = vmatprep.subr.bf16.mxu1 %v2462_v36 }
  0xdf   : > { %2185 = vmatpush1.bf16.msra.mxu0 %v2184_v38  ;;  %v2208_v38 = vpack.c.bf16 %v829_v35, %v827_v34 }
  0xe0   : > { %2187 = vmatprep.subr.bf16.mxu0 %v2186_v39  ;;  %v673_v39 = vld [vmem:[#allocation9 + $0x380] sm:$0xff] }
  0xe3   : > { %2189 = vmatpush1.bf16.msra.mxu0 %v2188_v42  ;;  %v2464_v42 = vpack.c.bf16 %v675_v40, %v673_v39 }
  0xe4   : > { %2191 = vmatprep.subr.bf16.mxu0 %v2190_v46  ;;  %v2210_v46 = vpack.c.bf16 %v834_v43, %v832_v41 }
  0xe5   : > { %2465 = vmatpush1.bf16.msra.mxu1 %v2464_v42 }
  0xe6   : > { %2467 = vmatprep.subr.bf16.mxu1 %v2466_v47 }
  0xe7   : > { %2193 = vmatpush1.bf16.msra.mxu0 %v2192_v51  ;;  %v2212_v51 = vpack.c.bf16 %v833_v49, %v831_v48  ;;  %v3374_v49 = vrot.slane %v1464_v27, %v3346_v32  ;;  %v850_v27 = vld [vmem:[#allocation9 + $0x838] sm:$0xff] }
  0xe8   : > { %2195 = vmatprep.subr.bf16.mxu0 %v2194_v58  ;;  %v684_v58 = vld [vmem:[#allocation9 + $0x3d8] sm:$0xff] }
  0xe9   : > { %v2470_v60 = vpack.c.bf16 %v684_v58, %v682_v57  ;;  %2469 = vmatpush1.bf16.msra.mxu1 %v2468_v55  ;;  %v3380_v57 = vrot.slane %v1463_v13, %v3346_v32 }
  0xeb   : > { %2197 = vmatpush1.bf16.msra.mxu0 %v2196_v63  ;;  %v683_v63 = vld [vmem:[#allocation9 + $0x3d0] sm:$0xff]  ;;  %2471 = vmatprep.subr.bf16.mxu1 %v2470_v60 }
  0xec   : > { %2199 = vmatprep.subr.bf16.mxu0 %v2198_v6  ;;  %v2472_v6 = vpack.c.bf16 %v683_v63, %v681_v62 }
  0xee   : > { %2473 = vmatpush1.bf16.msra.mxu1 %v2472_v6  ;;  %v845_v6 = vld [vmem:[#allocation9 + $0x810] sm:$0xff] }
  0xef   : > { %2201 = vmatpush1.bf16.msra.mxu0 %v2200_v11  ;;  %v685_v11 = vld [vmem:[#allocation9 + $0x3e0] sm:$0xff]  ;;  %2475 = vmatprep.subr.bf16.mxu1 %v2474_v10 }
  0xf0   : > { %2203 = vmatprep.subr.bf16.mxu0 %v2202_v18  ;;  %v2476_v16 = vpack.c.bf16 %v687_v12, %v685_v11  ;;  %v509_v18 = vrot.slane %v3077_v22, 2  ;;  %v344_v22 = vrot.slane %v339_v30, %v343_v29  ;;  %v689_v11 = vld [vmem:[#allocation9 + $0x400] sm:$0xff]  ;;  %v691_v12 = vld [vmem:[#allocation9 + $0x410] sm:$0xff] }
  0xf2   : > { %2477 = vmatpush1.bf16.msra.mxu1 %v2476_v16  ;;  %v1480_v14 = vcombine.low %v509_v18, %v510_v19 }
  0xf3   : > { %2205 = vmatpush1.bf16.msra.mxu0 %v2204_v25  ;;  %v2222_v25 = vpack.c.bf16 %v846_v21, %v844_v20  ;;  %2479 = vmatprep.subr.bf16.mxu1 %v2478_v28  ;;  %v2224_v20 = vpack.c.bf16 %v845_v6, %v843_v5  ;;  %v696_v28 = vld [vmem:[#allocation9 + $0x438] sm:$0xff]  ;;  %v855_v5 = vld [vmem:[#allocation9 + $0x860] sm:$0xff]  ;;  %v857_v6 = vld [vmem:[#allocation9 + $0x870] sm:$0xff] }
  0xf4   : > { %2207 = vmatprep.subr.bf16.mxu0 %v2206_v31  ;;  %v347_v31 = vsub.s32 1, %v3343_v23 }
  0xf6   : > { %v348_v33 = vrot.slane %v339_v30, %v347_v31 }
  0xf7   : > { %2209 = vmatpush1.bf16.msra.mxu0 %v2208_v38 }
  0xf8   : > { %2211 = vmatprep.subr.bf16.mxu0 %v2210_v46 }
  0xfb   : > { %2213 = vmatpush1.bf16.msra.mxu0 %v2212_v51 }
  0xfc   : > { %2215 = vmatprep.subr.bf16.mxu0 %v2214_v56  ;;  %v3377_v56 = vrot.slane %v1480_v14, %v3346_v32  ;;  %v694_v14 = vld [vmem:[#allocation9 + $0x428] sm:$0xff] }
  0xff   : > { %2217 = vmatpush1.bf16.msra.mxu0 %v2216_v4 }
 0x100   : > { %2219 = vmatprep.subr.bf16.mxu0 %v2218_v7 }
 0x103   : > { %2221 = vmatpush1.bf16.msra.mxu0 %v2220_v15 }
 0x104   : > { %2223 = vmatprep.subr.bf16.mxu0 %v2222_v25  ;;  %v2480_v25 = vpack.c.bf16 %v691_v12, %v689_v11  ;;  %v703_v11 = vld [vmem:[#allocation9 + $0x470] sm:$0xff]  ;;  %v860_v12 = vld [vmem:[#allocation9 + $0x888] sm:$0xff] }
 0x199   : > { %v432_v34 = vpop.f32.mrb[0].mxu0 }
 0x19a   : > { %v433_v35 = vadd.f32 %v432_v34, %v344_v22  ;;  %v434_v36 = vpop.f32.mrb[1].mxu0 }
 0x19b   : > { %v435_v38 = vadd.f32 %v434_v36, %v348_v33  ;;  %v849_v36 = vld [vmem:[#allocation9 + $0x830] sm:$0xff] }
 0x19d   : > { %v439_v39 = vcombine.low %v433_v35, %v435_v38  ;;  %v847_v35 = vld [vmem:[#allocation9 + $0x820] sm:$0xff] }
 0x19e   : > { %v693_v38 = vld [vmem:[#allocation9 + $0x420] sm:$0xff] }
 0x19f   : > { %v446_v40 = vrot.slane %v439_v39, %v3346_v32  ;;  %v695_v39 = vld [vmem:[#allocation9 + $0x430] sm:$0xff] }
 0x1a1   : > { %v447_v41 = vcombine.high %v446_v40, %v446_v40  ;;  %v469_v42 = vrot.slane %v446_v40, %v3346_v32  ;;  %v852_v40 = vld [vmem:[#allocation9 + $0x848] sm:$0xff] }
 0x1a3   : > { %v476_v43 = vrot.slane %v447_v41, %v3346_v32  ;;  %v477_v44 = vrot.slane %v469_v42, 7  ;;  %v2226_v42 = vpack.c.bf16 %v850_v27, %v848_v24  ;;  %v859_v24 = vld [vmem:[#allocation9 + $0x880] sm:$0xff] }
 0x1a5   : > { %v478_v45 = vrot.slane %v476_v43, 7  ;;  %481 = vst [vmem:[#allocation2 + $0x8] sm:$0x66] %v477_v44  ;;  %v2482_v43 = vpack.c.bf16 %v696_v28, %v694_v14  ;;  %v854_v44 = vld [vmem:[#allocation9 + $0x858] sm:$0xff]  ;;  %v705_v28 = vld [vmem:[#allocation9 + $0x480] sm:$0xff] }
 0x1a7   : > { %482 = vst [vmem:[#allocation2 + $0x10] sm:$0x66] %v478_v45  ;;  %v698_v45 = vld [vmem:[#allocation9 + $0x448] sm:$0xff] }
 0x1ac   : > { %v484_v46 = vld [vmem:[#allocation2 + $0x8] sm:$0xff] }
 0x1ad   : > { %v492_v47 = vcombine.high %v484_v46, %v484_v46  ;;  %v497_v52 = vrot.slane %v484_v46, 1  ;;  %v505_v54 = vrot.slane %v484_v46, 2 }
 0x1ae   : > { %v485_v48 = vld [vmem:[#allocation2 + $0x10] sm:$0xff] }
 0x1af   : > { %v493_v50 = vcombine.high %v485_v48, %v485_v48  ;;  %v536_v51 = vcombine.low %v484_v46, %v492_v47  ;;  %v498_v53 = vrot.slane %v492_v47, 1  ;;  %v506_v55 = vrot.slane %v492_v47, 2  ;;  %v700_v46 = vld [vmem:[#allocation9 + $0x458] sm:$0xff] }
 0x1b0   : > { %v499_v60 = vrot.slane %v485_v48, 1  ;;  %v507_v0 = vrot.slane %v485_v48, 2 }
 0x1b1   : > { %v753_v58 = vcombine.low %v485_v48, %v493_v50  ;;  %v537_v59 = vcombine.low %v497_v52, %v498_v53  ;;  %v500_v61 = vrot.slane %v493_v50, 1  ;;  %v3383_v62 = vrot.slane %v536_v51, %v3346_v32  ;;  %v851_v51 = vld [vmem:[#allocation9 + $0x840] sm:$0xff]  ;;  %v853_v52 = vld [vmem:[#allocation9 + $0x850] sm:$0xff] }
 0x1b2   : > { %v553_v63 = vcombine.low %v505_v54, %v506_v55  ;;  %v508_v1 = vrot.slane %v493_v50, 2  ;;  %v2228_v48 = vpack.c.bf16 %v849_v36, %v847_v35  ;;  %v2484_v50 = vpack.c.bf16 %v695_v39, %v693_v38  ;;  %v866_v35 = vld [vmem:[#allocation9 + $0x8b8] sm:$0xff]  ;;  %v710_v36 = vld [vmem:[#allocation9 + $0x4a8] sm:$0xff] }
 0x1b3   : > { %v3386_v2 = vrot.slane %v753_v58, %v3346_v32  ;;  %v551_v3 = vrot.slane %v537_v59, %v3346_v32  ;;  %v754_v4 = vcombine.low %v499_v60, %v500_v61  ;;  %v2106_v17 = vcombine.low %v3380_v57, %v3383_v62  ;;  %v697_v59 = vld [vmem:[#allocation9 + $0x440] sm:$0xff]  ;;  %v699_v60 = vld [vmem:[#allocation9 + $0x450] sm:$0xff]  ;;  %v856_v61 = vld [vmem:[#allocation9 + $0x868] sm:$0xff] }
 0x1b4   : > { %v3390_v7 = vrot.slane %v553_v63, %v3346_v32  ;;  %v770_v8 = vcombine.low %v507_v0, %v508_v1  ;;  %v2230_v55 = vpack.c.bf16 %v854_v44, %v852_v40  ;;  %v2486_v58 = vpack.c.bf16 %v700_v46, %v698_v45  ;;  %v858_v63 = vld [vmem:[#allocation9 + $0x878] sm:$0xff]  ;;  %v702_v0 = vld [vmem:[#allocation9 + $0x468] sm:$0xff]  ;;  %v709_v45 = vld [vmem:[#allocation9 + $0x4a0] sm:$0xff] }
 0x1b5   : > { %v2104_v9 = vcombine.low %v3383_v62, %v3386_v2  ;;  %v2107_v10 = vcombine.low %v3374_v49, %v551_v3  ;;  %v3396_v13 = vrot.slane %v754_v4, %v3346_v32  ;;  %v2108_v15 = vcombine.low %v3386_v2, %v3380_v57  ;;  %v704_v1 = vld [vmem:[#allocation9 + $0x478] sm:$0xff]  ;;  %v711_v46 = vld [vmem:[#allocation9 + $0x4b0] sm:$0xff]  ;;  %v1557_v57 = vld [vmem:[#allocation9 + $0xe20] sm:$0xff] }
 0x1b6   : > { %v1235_v16 = vcombine.low %v3377_v56, %v3390_v7  ;;  %v3403_v37 = vrot.slane %v770_v8, %v3346_v32  ;;  %v2488_v4 = vpack.c.bf16 %v699_v60, %v697_v59  ;;  %v2234_v8 = vpack.c.bf16 %v858_v63, %v856_v61  ;;  %v712_v38 = vld [vmem:[#allocation9 + $0x4b8] sm:$0xff]  ;;  %v869_v59 = vld [vmem:[#allocation9 + $0x8d0] sm:$0xff]  ;;  %v713_v63 = vld [vmem:[#allocation9 + $0x4c0] sm:$0xff] }
 0x1b7   : > { %v979_v18 = vrot.slane %v2104_v9, %v3346_v32  ;;  %v1232_v19 = vrot.slane %v2107_v10, %v3346_v32  ;;  %v2105_v21 = vcombine.low %v551_v3, %v3396_v13  ;;  %v2109_v53 = vcombine.low %v3396_v13, %v3374_v49  ;;  %v701_v10 = vld [vmem:[#allocation9 + $0x460] sm:$0xff]  ;;  %v1495_v2 = vld [vmem:[#allocation9 + $0xc30] sm:$0xff] }
 0x1b8   : > { %v3411_v26 = vrot.slane %v1235_v16, %v3346_v32  ;;  %v989_v30 = vcombine.low %v3390_v7, %v3403_v37  ;;  %v1699_v54 = vcombine.low %v3403_v37, %v3377_v56  ;;  %v2232_v3 = vpack.c.bf16 %v853_v52, %v851_v51  ;;  %v862_v16 = vld [vmem:[#allocation9 + $0x898] sm:$0xff] }
 0x1b9   : > { %v987_v22 = vcombine.high %v979_v18, %v979_v18  ;;  %v1234_v33 = vcombine.high %v1232_v19, %v1232_v19  ;;  %v3416_v34 = vrot.slane %v2105_v21, %v3346_v32  ;;  %v2490_v9 = vpack.c.bf16 %v704_v1, %v702_v0  ;;  %v716_v51 = vld [vmem:[#allocation9 + $0x4d8] sm:$0xff]  ;;  %v715_v0 = vld [vmem:[#allocation9 + $0x4d0] sm:$0xff]  ;;  %v872_v1 = vld [vmem:[#allocation9 + $0x8e8] sm:$0xff] }
 0x1ba   : > { %v1243_v47 = vcombine.high %v3411_v26, %v3411_v26  ;;  %v2492_v21 = vpack.c.bf16 %v703_v11, %v701_v10  ;;  %v2238_v27 = vpack.c.bf16 %v862_v16, %v860_v12  ;;  %v2498_v44 = vpack.c.bf16 %v712_v38, %v710_v36  ;;  %v873_v10 = vld [vmem:[#allocation9 + $0x8f0] sm:$0xff]  ;;  %v717_v16 = vld [vmem:[#allocation9 + $0x4e0] sm:$0xff]  ;;  %v880_v38 = vld [vmem:[#allocation9 + $0x928] sm:$0xff] }
 0x1bb   : > { %1068 = vmatprep.mubr.f32.mxu0 %v987_v22  ;;  %1385 = vmatprep.mubr.f32.mxu1 %v1234_v33  ;;  %v988_v41 = vcombine.high %v3416_v34, %v3416_v34  ;;  %v707_v22 = vld [vmem:[#allocation9 + $0x490] sm:$0xff]  ;;  %v864_v33 = vld [vmem:[#allocation9 + $0x8a8] sm:$0xff] }
 0x1bc   : > { %1069 = vmatmul.mubr.f32.vlgmr.msra.gmra.mrb[2].mxu0 %v979_v18  ;;  %1386 = vmatmul.mubr.f32.vlgmr.msra.gmra.mrb[0].mxu1 %v1232_v19  ;;  %v706_v18 = vld [vmem:[#allocation9 + $0x488] sm:$0xff]  ;;  %v708_v19 = vld [vmem:[#allocation9 + $0x498] sm:$0xff]  ;;  %v2496_v40 = vpack.c.bf16 %v707_v22, %v705_v28  ;;  %v877_v28 = vld [vmem:[#allocation9 + $0x910] sm:$0xff] }
 0x1bd   : > { %2225 = vmatpush1.bf16.msra.mxu0 %v2224_v20  ;;  %2481 = vmatpush1.bf16.msra.mxu1 %v2480_v25  ;;  %v2236_v20 = vpack.c.bf16 %v857_v6, %v855_v5  ;;  %v861_v25 = vld [vmem:[#allocation9 + $0x890] sm:$0xff]  ;;  %v2494_v14 = vpack.c.bf16 %v708_v19, %v706_v18  ;;  %v720_v5 = vld [vmem:[#allocation9 + $0x4f8] sm:$0xff]  ;;  %v876_v19 = vld [vmem:[#allocation9 + $0x908] sm:$0xff] }
 0x1be   : > { %1139 = vmatprep.mubr.f32.mxu0 %v988_v41  ;;  %1456 = vmatprep.mubr.f32.mxu1 %v1243_v47  ;;  %v2240_v39 = vpack.c.bf16 %v861_v25, %v859_v24  ;;  %v863_v41 = vld [vmem:[#allocation9 + $0x8a0] sm:$0xff]  ;;  %v868_v47 = vld [vmem:[#allocation9 + $0x8c8] sm:$0xff]  ;;  %v719_v18 = vld [vmem:[#allocation9 + $0x4f0] sm:$0xff] }
 0x1bf   : > { %2227 = vmatprep.subr.bf16.mxu0 %v2226_v42  ;;  %2483 = vmatprep.subr.bf16.mxu1 %v2482_v43  ;;  %v865_v42 = vld [vmem:[#allocation9 + $0x8b0] sm:$0xff]  ;;  %v2242_v43 = vpack.c.bf16 %v866_v35, %v864_v33  ;;  %v724_v24 = vld [vmem:[#allocation9 + $0x518] sm:$0xff]  ;;  %v721_v35 = vld [vmem:[#allocation9 + $0x500] sm:$0xff] }
 0x1c0   : > { %v2244_v52 = vpack.c.bf16 %v865_v42, %v863_v41  ;;  %v723_v36 = vld [vmem:[#allocation9 + $0x510] sm:$0xff]  ;;  %v728_v41 = vld [vmem:[#allocation9 + $0x538] sm:$0xff] }
 0x1c1   : > { %2229 = vmatpush1.bf16.msra.mxu0 %v2228_v48  ;;  %2485 = vmatpush1.bf16.msra.mxu1 %v2484_v50  ;;  %v870_v48 = vld [vmem:[#allocation9 + $0x8d8] sm:$0xff]  ;;  %v714_v50 = vld [vmem:[#allocation9 + $0x4c8] sm:$0xff] }
 0x1c2   : > { %2231 = vmatprep.subr.bf16.mxu0 %v2230_v55  ;;  %2487 = vmatprep.subr.bf16.mxu1 %v2486_v58  ;;  %v2500_v55 = vpack.c.bf16 %v711_v46, %v709_v45  ;;  %v867_v58 = vld [vmem:[#allocation9 + $0x8c0] sm:$0xff]  ;;  %v2246_v60 = vpack.c.bf16 %v870_v48, %v868_v47  ;;  %v2502_v61 = vpack.c.bf16 %v716_v51, %v714_v50  ;;  %v881_v45 = vld [vmem:[#allocation9 + $0x930] sm:$0xff]  ;;  %v884_v51 = vld [vmem:[#allocation9 + $0x948] sm:$0xff] }
 0x1c3   : > { %v2248_v6 = vpack.c.bf16 %v869_v59, %v867_v58  ;;  %v725_v48 = vld [vmem:[#allocation9 + $0x520] sm:$0xff]  ;;  %v727_v50 = vld [vmem:[#allocation9 + $0x530] sm:$0xff]  ;;  %v732_v58 = vld [vmem:[#allocation9 + $0x558] sm:$0xff] }
 0x1c5   : > { %2233 = vmatpush1.bf16.msra.mxu0 %v2232_v3  ;;  %2489 = vmatpush1.bf16.msra.mxu1 %v2488_v4  ;;  %v874_v3 = vld [vmem:[#allocation9 + $0x8f8] sm:$0xff]  ;;  %v718_v4 = vld [vmem:[#allocation9 + $0x4e8] sm:$0xff] }
 0x1c6   : > { %2235 = vmatprep.subr.bf16.mxu0 %v2234_v8  ;;  %2491 = vmatprep.subr.bf16.mxu1 %v2490_v9  ;;  %v2504_v8 = vpack.c.bf16 %v715_v0, %v713_v63  ;;  %v871_v9 = vld [vmem:[#allocation9 + $0x8e0] sm:$0xff]  ;;  %v2250_v11 = vpack.c.bf16 %v874_v3, %v872_v1  ;;  %v2506_v12 = vpack.c.bf16 %v720_v5, %v718_v4  ;;  %v885_v63 = vld [vmem:[#allocation9 + $0x950] sm:$0xff]  ;;  %v888_v5 = vld [vmem:[#allocation9 + $0x968] sm:$0xff] }
 0x1c7   : > { %v2252_v25 = vpack.c.bf16 %v873_v10, %v871_v9  ;;  %v729_v3 = vld [vmem:[#allocation9 + $0x540] sm:$0xff]  ;;  %v731_v4 = vld [vmem:[#allocation9 + $0x550] sm:$0xff]  ;;  %v736_v9 = vld [vmem:[#allocation9 + $0x578] sm:$0xff] }
 0x1c9   : > { %2237 = vmatpush1.bf16.msra.mxu0 %v2236_v20  ;;  %2493 = vmatpush1.bf16.msra.mxu1 %v2492_v21  ;;  %v878_v20 = vld [vmem:[#allocation9 + $0x918] sm:$0xff]  ;;  %v722_v21 = vld [vmem:[#allocation9 + $0x508] sm:$0xff] }
 0x1ca   : > { %2239 = vmatprep.subr.bf16.mxu0 %v2238_v27  ;;  %2495 = vmatprep.subr.bf16.mxu1 %v2494_v14  ;;  %v2508_v27 = vpack.c.bf16 %v719_v18, %v717_v16  ;;  %v875_v14 = vld [vmem:[#allocation9 + $0x900] sm:$0xff]  ;;  %v2254_v22 = vpack.c.bf16 %v878_v20, %v876_v19  ;;  %v2510_v33 = vpack.c.bf16 %v724_v24, %v722_v21  ;;  %v889_v16 = vld [vmem:[#allocation9 + $0x970] sm:$0xff]  ;;  %v892_v24 = vld [vmem:[#allocation9 + $0x988] sm:$0xff] }
 0x1cb   : > { %v2256_v42 = vpack.c.bf16 %v877_v28, %v875_v14  ;;  %v733_v20 = vld [vmem:[#allocation9 + $0x560] sm:$0xff]  ;;  %v735_v21 = vld [vmem:[#allocation9 + $0x570] sm:$0xff]  ;;  %v740_v14 = vld [vmem:[#allocation9 + $0x598] sm:$0xff] }
 0x1cd   : > { %2241 = vmatpush1.bf16.msra.mxu0 %v2240_v39  ;;  %2497 = vmatpush1.bf16.msra.mxu1 %v2496_v40  ;;  %v882_v39 = vld [vmem:[#allocation9 + $0x938] sm:$0xff]  ;;  %v726_v40 = vld [vmem:[#allocation9 + $0x528] sm:$0xff] }
 0x1ce   : > { %2243 = vmatprep.subr.bf16.mxu0 %v2242_v43  ;;  %2499 = vmatprep.subr.bf16.mxu1 %v2498_v44  ;;  %v2512_v43 = vpack.c.bf16 %v723_v36, %v721_v35  ;;  %v879_v44 = vld [vmem:[#allocation9 + $0x920] sm:$0xff]  ;;  %v2258_v46 = vpack.c.bf16 %v882_v39, %v880_v38  ;;  %v2514_v47 = vpack.c.bf16 %v728_v41, %v726_v40  ;;  %v893_v35 = vld [vmem:[#allocation9 + $0x990] sm:$0xff]  ;;  %v896_v41 = vld [vmem:[#allocation9 + $0x9a8] sm:$0xff] }
 0x1cf   : > { %v2260_v59 = vpack.c.bf16 %v881_v45, %v879_v44  ;;  %v737_v39 = vld [vmem:[#allocation9 + $0x580] sm:$0xff]  ;;  %v739_v40 = vld [vmem:[#allocation9 + $0x590] sm:$0xff]  ;;  %v744_v44 = vld [vmem:[#allocation9 + $0x5b8] sm:$0xff] }
 0x1d1   : > { %2245 = vmatpush1.bf16.msra.mxu0 %v2244_v52  ;;  %2501 = vmatpush1.bf16.msra.mxu1 %v2500_v55  ;;  %v886_v52 = vld [vmem:[#allocation9 + $0x958] sm:$0xff]  ;;  %v730_v55 = vld [vmem:[#allocation9 + $0x548] sm:$0xff] }
 0x1d2   : > { %2247 = vmatprep.subr.bf16.mxu0 %v2246_v60  ;;  %2503 = vmatprep.subr.bf16.mxu1 %v2502_v61  ;;  %v2516_v60 = vpack.c.bf16 %v727_v50, %v725_v48  ;;  %v883_v61 = vld [vmem:[#allocation9 + $0x940] sm:$0xff]  ;;  %v2262_v0 = vpack.c.bf16 %v886_v52, %v884_v51  ;;  %v2518_v1 = vpack.c.bf16 %v732_v58, %v730_v55  ;;  %v897_v48 = vld [vmem:[#allocation9 + $0x9b0] sm:$0xff]  ;;  %v900_v58 = vld [vmem:[#allocation9 + $0x9c8] sm:$0xff] }
 0x1d3   : > { %v2264_v10 = vpack.c.bf16 %v885_v63, %v883_v61  ;;  %v741_v52 = vld [vmem:[#allocation9 + $0x5a0] sm:$0xff]  ;;  %v743_v55 = vld [vmem:[#allocation9 + $0x5b0] sm:$0xff]  ;;  %v748_v61 = vld [vmem:[#allocation9 + $0x5d8] sm:$0xff] }
 0x1d5   : > { %2249 = vmatpush1.bf16.msra.mxu0 %v2248_v6  ;;  %2505 = vmatpush1.bf16.msra.mxu1 %v2504_v8  ;;  %v890_v6 = vld [vmem:[#allocation9 + $0x978] sm:$0xff]  ;;  %v734_v8 = vld [vmem:[#allocation9 + $0x568] sm:$0xff] }
 0x1d6   : > { %2251 = vmatprep.subr.bf16.mxu0 %v2250_v11  ;;  %2507 = vmatprep.subr.bf16.mxu1 %v2506_v12  ;;  %v2520_v11 = vpack.c.bf16 %v731_v4, %v729_v3  ;;  %v887_v12 = vld [vmem:[#allocation9 + $0x960] sm:$0xff]  ;;  %v2266_v18 = vpack.c.bf16 %v890_v6, %v888_v5  ;;  %v2522_v19 = vpack.c.bf16 %v736_v9, %v734_v8  ;;  %v901_v3 = vld [vmem:[#allocation9 + $0x9d0] sm:$0xff]  ;;  %v904_v9 = vld [vmem:[#allocation9 + $0x9e8] sm:$0xff] }
 0x1d7   : > { %v2268_v28 = vpack.c.bf16 %v889_v16, %v887_v12  ;;  %v745_v6 = vld [vmem:[#allocation9 + $0x5c0] sm:$0xff]  ;;  %v747_v8 = vld [vmem:[#allocation9 + $0x5d0] sm:$0xff]  ;;  %v752_v12 = vld [vmem:[#allocation9 + $0x5f8] sm:$0xff] }
 0x1d9   : > { %2253 = vmatpush1.bf16.msra.mxu0 %v2252_v25  ;;  %2509 = vmatpush1.bf16.msra.mxu1 %v2508_v27  ;;  %v894_v25 = vld [vmem:[#allocation9 + $0x998] sm:$0xff]  ;;  %v738_v27 = vld [vmem:[#allocation9 + $0x588] sm:$0xff] }
 0x1da   : > { %2255 = vmatprep.subr.bf16.mxu0 %v2254_v22  ;;  %2511 = vmatprep.subr.bf16.mxu1 %v2510_v33  ;;  %v2524_v22 = vpack.c.bf16 %v735_v21, %v733_v20  ;;  %v891_v33 = vld [vmem:[#allocation9 + $0x980] sm:$0xff]  ;;  %v2270_v36 = vpack.c.bf16 %v894_v25, %v892_v24  ;;  %v2526_v38 = vpack.c.bf16 %v740_v14, %v738_v27  ;;  %v905_v20 = vld [vmem:[#allocation9 + $0x9f0] sm:$0xff]  ;;  %v908_v14 = vld [vmem:[#allocation9 + $0xa08] sm:$0xff] }
 0x1db   : > { %v2272_v45 = vpack.c.bf16 %v893_v35, %v891_v33  ;;  %v749_v25 = vld [vmem:[#allocation9 + $0x5e0] sm:$0xff]  ;;  %v751_v27 = vld [vmem:[#allocation9 + $0x5f0] sm:$0xff]  ;;  %v1492_v33 = vld [vmem:[#allocation9 + $0xc18] sm:$0xff] }
 0x1dd   : > { %2257 = vmatpush1.bf16.msra.mxu0 %v2256_v42  ;;  %2513 = vmatpush1.bf16.msra.mxu1 %v2512_v43  ;;  %v898_v42 = vld [vmem:[#allocation9 + $0x9b8] sm:$0xff]  ;;  %v742_v43 = vld [vmem:[#allocation9 + $0x5a8] sm:$0xff] }
 0x1de   : > { %2259 = vmatprep.subr.bf16.mxu0 %v2258_v46  ;;  %2515 = vmatprep.subr.bf16.mxu1 %v2514_v47  ;;  %v2528_v46 = vpack.c.bf16 %v739_v40, %v737_v39  ;;  %v895_v47 = vld [vmem:[#allocation9 + $0x9a0] sm:$0xff]  ;;  %v2274_v50 = vpack.c.bf16 %v898_v42, %v896_v41  ;;  %v2530_v51 = vpack.c.bf16 %v744_v44, %v742_v43  ;;  %v909_v41 = vld [vmem:[#allocation9 + $0xa10] sm:$0xff] }
 0x1df   : > { %v2276_v63 = vpack.c.bf16 %v897_v48, %v895_v47  ;;  %v907_v40 = vld [vmem:[#allocation9 + $0xa00] sm:$0xff]  ;;  %v3430_v42 = vrot.slane %v989_v30, %v3346_v32  ;;  %v1491_v44 = vld [vmem:[#allocation9 + $0xc10] sm:$0xff]  ;;  %v914_v47 = vld [vmem:[#allocation9 + $0xa38] sm:$0xff] }
 0x1e0   : > { %v1489_v43 = vld [vmem:[#allocation9 + $0xc00] sm:$0xff]  ;;  %v1494_v48 = vld [vmem:[#allocation9 + $0xc28] sm:$0xff] }
 0x1e1   : > { %2261 = vmatpush1.bf16.msra.mxu0 %v2260_v59  ;;  %2517 = vmatpush1.bf16.msra.mxu1 %v2516_v60  ;;  %v902_v59 = vld [vmem:[#allocation9 + $0x9d8] sm:$0xff]  ;;  %v746_v60 = vld [vmem:[#allocation9 + $0x5c8] sm:$0xff]  ;;  %v2544_v7 = vpack.c.bf16 %v1491_v44, %v1489_v43  ;;  %v911_v30 = vld [vmem:[#allocation9 + $0xa20] sm:$0xff] }
 0x1e2   : > { %2263 = vmatprep.subr.bf16.mxu0 %v2262_v0  ;;  %2519 = vmatprep.subr.bf16.mxu1 %v2518_v1  ;;  %v2532_v0 = vpack.c.bf16 %v743_v55, %v741_v52  ;;  %v899_v1 = vld [vmem:[#allocation9 + $0x9c0] sm:$0xff]  ;;  %v2278_v4 = vpack.c.bf16 %v902_v59, %v900_v58  ;;  %v2534_v5 = vpack.c.bf16 %v748_v61, %v746_v60  ;;  %v913_v52 = vld [vmem:[#allocation9 + $0xa30] sm:$0xff]  ;;  %v918_v61 = vld [vmem:[#allocation9 + $0xa58] sm:$0xff] }
 0x1e3   : > { %v2280_v16 = vpack.c.bf16 %v901_v3, %v899_v1  ;;  %v1493_v55 = vld [vmem:[#allocation9 + $0xc20] sm:$0xff]  ;;  %v997_v58 = vcombine.high %v3430_v42, %v3430_v42  ;;  %v1500_v1 = vld [vmem:[#allocation9 + $0xc58] sm:$0xff]  ;;  %v2292_v3 = vpack.c.bf16 %v913_v52, %v911_v30 }
 0x1e4   : > { %v1505_v43 = vld [vmem:[#allocation9 + $0xc80] sm:$0xff] }
 0x1e5   : > { %2265 = vmatpush1.bf16.msra.mxu0 %v2264_v10  ;;  %2521 = vmatpush1.bf16.msra.mxu1 %v2520_v11  ;;  %v906_v10 = vld [vmem:[#allocation9 + $0x9f8] sm:$0xff]  ;;  %v750_v11 = vld [vmem:[#allocation9 + $0x5e8] sm:$0xff] }
 0x1e6   : > { %2267 = vmatprep.subr.bf16.mxu0 %v2266_v18  ;;  %2523 = vmatprep.subr.bf16.mxu1 %v2522_v19  ;;  %v2536_v18 = vpack.c.bf16 %v747_v8, %v745_v6  ;;  %v903_v19 = vld [vmem:[#allocation9 + $0x9e0] sm:$0xff]  ;;  %v2282_v21 = vpack.c.bf16 %v906_v10, %v904_v9  ;;  %v2538_v24 = vpack.c.bf16 %v752_v12, %v750_v11  ;;  %v917_v8 = vld [vmem:[#allocation9 + $0xa50] sm:$0xff]  ;;  %v922_v11 = vld [vmem:[#allocation9 + $0xa78] sm:$0xff] }
 0x1e7   : > { %v2284_v35 = vpack.c.bf16 %v905_v20, %v903_v19  ;;  %v915_v6 = vld [vmem:[#allocation9 + $0xa40] sm:$0xff]  ;;  %v1499_v10 = vld [vmem:[#allocation9 + $0xc50] sm:$0xff]  ;;  %v1502_v12 = vld [vmem:[#allocation9 + $0xc68] sm:$0xff] }
 0x1e8   : > { %v1497_v9 = vld [vmem:[#allocation9 + $0xc40] sm:$0xff] }
 0x1e9   : > { %2269 = vmatpush1.bf16.msra.mxu0 %v2268_v28  ;;  %2525 = vmatpush1.bf16.msra.mxu1 %v2524_v22  ;;  %v910_v28 = vld [vmem:[#allocation9 + $0xa18] sm:$0xff]  ;;  %v1490_v22 = vld [vmem:[#allocation9 + $0xc08] sm:$0xff]  ;;  %v2552_v19 = vpack.c.bf16 %v1499_v10, %v1497_v9 }
 0x1ea   : > { %2271 = vmatprep.subr.bf16.mxu0 %v2270_v36  ;;  %2527 = vmatprep.subr.bf16.mxu1 %v2526_v38  ;;  %v2540_v36 = vpack.c.bf16 %v751_v27, %v749_v25  ;;  %v2286_v38 = vpack.c.bf16 %v910_v28, %v908_v14  ;;  %v2542_v39 = vpack.c.bf16 %v1492_v33, %v1490_v22  ;;  %v1501_v25 = vld [vmem:[#allocation9 + $0xc60] sm:$0xff]  ;;  %v1503_v14 = vld [vmem:[#allocation9 + $0xc70] sm:$0xff]  ;;  %v924_v28 = vld [vmem:[#allocation9 + $0xa88] sm:$0xff] }
 0x1eb   : > { %v926_v22 = vld [vmem:[#allocation9 + $0xa98] sm:$0xff]  ;;  %v1506_v33 = vld [vmem:[#allocation9 + $0xc88] sm:$0xff] }
 0x1ec   : > { %v936_v10 = vld [vmem:[#allocation9 + $0xae8] sm:$0xff] }
 0x1ed   : > { %2273 = vmatpush1.bf16.msra.mxu0 %v2272_v45  ;;  %2529 = vmatpush1.bf16.msra.mxu1 %v2528_v46  ;;  %v912_v45 = vld [vmem:[#allocation9 + $0xa28] sm:$0xff]  ;;  %v3436_v46 = vrot.slane %v2108_v15, %v3346_v32 }
 0x1ee   : > { %2275 = vmatprep.subr.bf16.mxu0 %v2274_v50  ;;  %2531 = vmatprep.subr.bf16.mxu1 %v2530_v51  ;;  %v1496_v50 = vld [vmem:[#allocation9 + $0xc38] sm:$0xff]  ;;  %v2288_v51 = vpack.c.bf16 %v909_v41, %v907_v40  ;;  %v2290_v59 = vpack.c.bf16 %v914_v47, %v912_v45  ;;  %v916_v15 = vld [vmem:[#allocation9 + $0xa48] sm:$0xff]  ;;  %v923_v40 = vld [vmem:[#allocation9 + $0xa80] sm:$0xff] }
 0x1ef   : > { %v2546_v60 = vpack.c.bf16 %v1496_v50, %v1494_v48  ;;  %v925_v41 = vld [vmem:[#allocation9 + $0xa90] sm:$0xff]  ;;  %v928_v47 = vld [vmem:[#allocation9 + $0xaa8] sm:$0xff]  ;;  %v930_v48 = vld [vmem:[#allocation9 + $0xab8] sm:$0xff] }
 0x1f0   : > { %v1507_v45 = vld [vmem:[#allocation9 + $0xc90] sm:$0xff]  ;;  %v1510_v50 = vld [vmem:[#allocation9 + $0xca8] sm:$0xff]  ;;  %v2306_v52 = vpack.c.bf16 %v930_v48, %v928_v47  ;;  %v946_v47 = vld [vmem:[#allocation9 + $0xb38] sm:$0xff] }
 0x1f1   : > { %2277 = vmatpush1.bf16.msra.mxu0 %v2276_v63  ;;  %2533 = vmatpush1.bf16.msra.mxu1 %v2532_v0  ;;  %v1697_v63 = vcombine.high %v3436_v46, %v3436_v46  ;;  %v1498_v0 = vld [vmem:[#allocation9 + $0xc48] sm:$0xff]  ;;  %v2560_v30 = vpack.c.bf16 %v1507_v45, %v1505_v43 }
 0x1f2   : > { %2279 = vmatprep.subr.bf16.mxu0 %v2278_v4  ;;  %2535 = vmatprep.subr.bf16.mxu1 %v2534_v5  ;;  %v2548_v4 = vpack.c.bf16 %v1495_v2, %v1493_v55  ;;  %v2294_v5 = vpack.c.bf16 %v918_v61, %v916_v15  ;;  %v927_v55 = vld [vmem:[#allocation9 + $0xaa0] sm:$0xff]  ;;  %v1511_v2 = vld [vmem:[#allocation9 + $0xcb0] sm:$0xff]  ;;  %v932_v15 = vld [vmem:[#allocation9 + $0xac8] sm:$0xff] }
 0x1f3   : > { %v934_v61 = vld [vmem:[#allocation9 + $0xad8] sm:$0xff]  ;;  %v944_v45 = vld [vmem:[#allocation9 + $0xb28] sm:$0xff] }
 0x1f4   : > { %v1526_v48 = vld [vmem:[#allocation9 + $0xd28] sm:$0xff] }
 0x1f5   : > { %2281 = vmatpush1.bf16.msra.mxu0 %v2280_v16  ;;  %2537 = vmatpush1.bf16.msra.mxu1 %v2536_v18  ;;  %v1504_v16 = vld [vmem:[#allocation9 + $0xc78] sm:$0xff]  ;;  %v2296_v18 = vpack.c.bf16 %v917_v8, %v915_v6  ;;  %v933_v6 = vld [vmem:[#allocation9 + $0xad0] sm:$0xff]  ;;  %v1513_v8 = vld [vmem:[#allocation9 + $0xcc0] sm:$0xff] }
 0x1f6   : > { %2283 = vmatprep.subr.bf16.mxu0 %v2282_v21  ;;  %2539 = vmatprep.subr.bf16.mxu1 %v2538_v24  ;;  %v919_v21 = vld [vmem:[#allocation9 + $0xa60] sm:$0xff]  ;;  %v921_v24 = vld [vmem:[#allocation9 + $0xa70] sm:$0xff]  ;;  %v2554_v27 = vpack.c.bf16 %v1504_v16, %v1502_v12  ;;  %v1520_v12 = vld [vmem:[#allocation9 + $0xcf8] sm:$0xff] }
 0x1f9   : > { %2285 = vmatpush1.bf16.msra.mxu0 %v2284_v35  ;;  %2541 = vmatpush1.bf16.msra.mxu1 %v2540_v36  ;;  %v1508_v35 = vld [vmem:[#allocation9 + $0xc98] sm:$0xff]  ;;  %v2300_v36 = vpack.c.bf16 %v921_v24, %v919_v21  ;;  %v937_v21 = vld [vmem:[#allocation9 + $0xaf0] sm:$0xff]  ;;  %v1517_v24 = vld [vmem:[#allocation9 + $0xce0] sm:$0xff] }
 0x1fa   : > { %2287 = vmatprep.subr.bf16.mxu0 %v2286_v38  ;;  %2543 = vmatprep.subr.bf16.mxu1 %v2542_v39  ;;  %v2556_v38 = vpack.c.bf16 %v1503_v14, %v1501_v25  ;;  %v2302_v39 = vpack.c.bf16 %v926_v22, %v924_v28  ;;  %v2558_v44 = vpack.c.bf16 %v1508_v35, %v1506_v33  ;;  %v940_v14 = vld [vmem:[#allocation9 + $0xb08] sm:$0xff]  ;;  %v942_v28 = vld [vmem:[#allocation9 + $0xb18] sm:$0xff] }
 0x1fb   : > { %v1522_v22 = vld [vmem:[#allocation9 + $0xd08] sm:$0xff]  ;;  %v1524_v33 = vld [vmem:[#allocation9 + $0xd18] sm:$0xff] }
 0x1fc   : > { %1140 = vmatmul.mubr.f32.vlgmr.msra.gmra.mrb[2].mxu0 %v3416_v34  ;;  %1457 = vmatmul.mubr.f32.vlgmr.msra.gmra.mrb[0].mxu1 %v3411_v26  ;;  %v2550_v34 = vpack.c.bf16 %v1500_v1, %v1498_v0  ;;  %v920_v26 = vld [vmem:[#allocation9 + $0xa68] sm:$0xff]  ;;  %v1516_v0 = vld [vmem:[#allocation9 + $0xcd8] sm:$0xff]  ;;  %v2574_v43 = vpack.c.bf16 %v1524_v33, %v1522_v22 }
 0x1fd   : > { %2289 = vmatpush1.bf16.msra.mxu0 %v2288_v51  ;;  %1210 = vmatprep.mubr.f32.mxu0 %v997_v58  ;;  %v2298_v20 = vpack.c.bf16 %v922_v11, %v920_v26  ;;  %v1512_v51 = vld [vmem:[#allocation9 + $0xcb8] sm:$0xff]  ;;  %v929_v58 = vld [vmem:[#allocation9 + $0xab0] sm:$0xff]  ;;  %v1518_v11 = vld [vmem:[#allocation9 + $0xce8] sm:$0xff] }
 0x1fe   : > { %2545 = vmatpush1.bf16.msra.mxu1 %v2544_v7  ;;  %1778 = vmatprep.mubr.f32.mxu1 %v1697_v63  ;;  %v2304_v7 = vpack.c.bf16 %v925_v41, %v923_v40  ;;  %v1514_v63 = vld [vmem:[#allocation9 + $0xcc8] sm:$0xff]  ;;  %v2308_v1 = vpack.c.bf16 %v929_v58, %v927_v55  ;;  %v938_v26 = vld [vmem:[#allocation9 + $0xaf8] sm:$0xff]  ;;  %v2570_v25 = vpack.c.bf16 %v1520_v12, %v1518_v11  ;;  %v941_v40 = vld [vmem:[#allocation9 + $0xb10] sm:$0xff] }
 0x1ff   : > { %2291 = vmatprep.subr.bf16.mxu0 %v2290_v59  ;;  %2547 = vmatprep.subr.bf16.mxu1 %v2546_v60  ;;  %v1509_v59 = vld [vmem:[#allocation9 + $0xca0] sm:$0xff]  ;;  %v2562_v60 = vpack.c.bf16 %v1512_v51, %v1510_v50  ;;  %v2566_v9 = vpack.c.bf16 %v1516_v0, %v1514_v63  ;;  %v1528_v50 = vld [vmem:[#allocation9 + $0xd38] sm:$0xff]  ;;  %v945_v55 = vld [vmem:[#allocation9 + $0xb30] sm:$0xff] }
 0x200   : > { %v1521_v41 = vld [vmem:[#allocation9 + $0xd00] sm:$0xff]  ;;  %v1532_v63 = vld [vmem:[#allocation9 + $0xd58] sm:$0xff] }
 0x201   : > { %2293 = vmatpush1.bf16.msra.mxu0 %v2292_v3  ;;  %v2564_v3 = vpack.c.bf16 %v1511_v2, %v1509_v59  ;;  %v1525_v58 = vld [vmem:[#allocation9 + $0xd20] sm:$0xff]  ;;  %v2578_v59 = vpack.c.bf16 %v1528_v50, %v1526_v48  ;;  %v948_v2 = vld [vmem:[#allocation9 + $0xb48] sm:$0xff]  ;;  %v1536_v11 = vld [vmem:[#allocation9 + $0xd78] sm:$0xff] }
 0x202   : > { %2549 = vmatpush1.bf16.msra.mxu1 %v2548_v4  ;;  %2295 = vmatprep.subr.bf16.mxu0 %v2294_v5  ;;  %v2310_v4 = vpack.c.bf16 %v934_v61, %v932_v15  ;;  %v931_v5 = vld [vmem:[#allocation9 + $0xac0] sm:$0xff]  ;;  %v950_v15 = vld [vmem:[#allocation9 + $0xb58] sm:$0xff]  ;;  %v1530_v61 = vld [vmem:[#allocation9 + $0xd48] sm:$0xff] }
 0x203   : > { %2551 = vmatprep.subr.bf16.mxu1 %v2550_v34  ;;  %v1515_v34 = vld [vmem:[#allocation9 + $0xcd0] sm:$0xff]  ;;  %v2312_v16 = vpack.c.bf16 %v933_v6, %v931_v5  ;;  %v1529_v6 = vld [vmem:[#allocation9 + $0xd40] sm:$0xff]  ;;  %v1540_v22 = vld [vmem:[#allocation9 + $0xd98] sm:$0xff] }
 0x204   : > { %v949_v5 = vld [vmem:[#allocation9 + $0xb50] sm:$0xff]  ;;  %v1544_v48 = vld [vmem:[#allocation9 + $0xdb8] sm:$0xff] }
 0x205   : > { %2297 = vmatpush1.bf16.msra.mxu0 %v2296_v18  ;;  %v2568_v18 = vpack.c.bf16 %v1515_v34, %v1513_v8  ;;  %v2582_v8 = vpack.c.bf16 %v1532_v63, %v1530_v61  ;;  %v952_v34 = vld [vmem:[#allocation9 + $0xb68] sm:$0xff]  ;;  %v1548_v61 = vld [vmem:[#allocation9 + $0xdd8] sm:$0xff] }
 0x206   : > { %2553 = vmatpush1.bf16.msra.mxu1 %v2552_v19  ;;  %2299 = vmatprep.subr.bf16.mxu0 %v2298_v20  ;;  %v2314_v19 = vpack.c.bf16 %v938_v26, %v936_v10  ;;  %v935_v20 = vld [vmem:[#allocation9 + $0xae0] sm:$0xff]  ;;  %v954_v10 = vld [vmem:[#allocation9 + $0xb78] sm:$0xff]  ;;  %v1534_v26 = vld [vmem:[#allocation9 + $0xd68] sm:$0xff] }
 0x207   : > { %2555 = vmatprep.subr.bf16.mxu1 %v2554_v27  ;;  %v1519_v27 = vld [vmem:[#allocation9 + $0xcf0] sm:$0xff]  ;;  %v2316_v35 = vpack.c.bf16 %v937_v21, %v935_v20  ;;  %v1533_v21 = vld [vmem:[#allocation9 + $0xd60] sm:$0xff] }
 0x208   : > { %v953_v20 = vld [vmem:[#allocation9 + $0xb70] sm:$0xff] }
 0x209   : > { %2301 = vmatpush1.bf16.msra.mxu0 %v2300_v36  ;;  %v2572_v36 = vpack.c.bf16 %v1519_v27, %v1517_v24  ;;  %v2586_v24 = vpack.c.bf16 %v1536_v11, %v1534_v26  ;;  %v956_v27 = vld [vmem:[#allocation9 + $0xb88] sm:$0xff]  ;;  %v1552_v26 = vld [vmem:[#allocation9 + $0xdf8] sm:$0xff] }
 0x20a   : > { %2557 = vmatpush1.bf16.msra.mxu1 %v2556_v38  ;;  %2303 = vmatprep.subr.bf16.mxu0 %v2302_v39  ;;  %v2318_v38 = vpack.c.bf16 %v942_v28, %v940_v14  ;;  %v939_v39 = vld [vmem:[#allocation9 + $0xb00] sm:$0xff]  ;;  %v958_v14 = vld [vmem:[#allocation9 + $0xb98] sm:$0xff]  ;;  %v1538_v28 = vld [vmem:[#allocation9 + $0xd88] sm:$0xff] }
 0x20b   : > { %2559 = vmatprep.subr.bf16.mxu1 %v2558_v44  ;;  %v1523_v44 = vld [vmem:[#allocation9 + $0xd10] sm:$0xff]  ;;  %v2320_v51 = vpack.c.bf16 %v941_v40, %v939_v39  ;;  %v1537_v40 = vld [vmem:[#allocation9 + $0xd80] sm:$0xff] }
 0x20c   : > { %v957_v39 = vld [vmem:[#allocation9 + $0xb90] sm:$0xff] }
 0x20d   : > { %2305 = vmatpush1.bf16.msra.mxu0 %v2304_v7  ;;  %v2576_v7 = vpack.c.bf16 %v1523_v44, %v1521_v41  ;;  %v2590_v41 = vpack.c.bf16 %v1540_v22, %v1538_v28  ;;  %v960_v44 = vld [vmem:[#allocation9 + $0xba8] sm:$0xff]  ;;  %v1556_v28 = vld [vmem:[#allocation9 + $0xe18] sm:$0xff] }
 0x20e   : > { %2561 = vmatpush1.bf16.msra.mxu1 %v2560_v30  ;;  %2307 = vmatprep.subr.bf16.mxu0 %v2306_v52  ;;  %v2322_v30 = vpack.c.bf16 %v946_v47, %v944_v45  ;;  %v943_v52 = vld [vmem:[#allocation9 + $0xb20] sm:$0xff]  ;;  %v962_v45 = vld [vmem:[#allocation9 + $0xbb8] sm:$0xff]  ;;  %v1542_v47 = vld [vmem:[#allocation9 + $0xda8] sm:$0xff] }
 0x20f   : > { %2563 = vmatprep.subr.bf16.mxu1 %v2562_v60  ;;  %v1527_v60 = vld [vmem:[#allocation9 + $0xd30] sm:$0xff]  ;;  %v2324_v0 = vpack.c.bf16 %v945_v55, %v943_v52  ;;  %v1541_v55 = vld [vmem:[#allocation9 + $0xda0] sm:$0xff] }
 0x210   : > { %v961_v52 = vld [vmem:[#allocation9 + $0xbb0] sm:$0xff] }
 0x211   : > { %2309 = vmatpush1.bf16.msra.mxu0 %v2308_v1  ;;  %v2580_v1 = vpack.c.bf16 %v1527_v60, %v1525_v58  ;;  %v2594_v58 = vpack.c.bf16 %v1544_v48, %v1542_v47  ;;  %v964_v60 = vld [vmem:[#allocation9 + $0xbc8] sm:$0xff]  ;;  %v3454_v48 = vrot.slane %v2109_v53, %v3346_v32 }
 0x212   : > { %2565 = vmatpush1.bf16.msra.mxu1 %v2564_v3  ;;  %2311 = vmatprep.subr.bf16.mxu0 %v2310_v4  ;;  %v2326_v3 = vpack.c.bf16 %v950_v15, %v948_v2  ;;  %v947_v4 = vld [vmem:[#allocation9 + $0xb40] sm:$0xff]  ;;  %v966_v2 = vld [vmem:[#allocation9 + $0xbd8] sm:$0xff]  ;;  %v1546_v15 = vld [vmem:[#allocation9 + $0xdc8] sm:$0xff] }
 0x213   : > { %2567 = vmatprep.subr.bf16.mxu1 %v2566_v9  ;;  %v1531_v9 = vld [vmem:[#allocation9 + $0xd50] sm:$0xff]  ;;  %v2328_v12 = vpack.c.bf16 %v949_v5, %v947_v4  ;;  %v1545_v5 = vld [vmem:[#allocation9 + $0xdc0] sm:$0xff]  ;;  %v1562_v53 = vld [vmem:[#allocation9 + $0xe48] sm:$0xff] }
 0x214   : > { %v965_v4 = vld [vmem:[#allocation9 + $0xbd0] sm:$0xff] }
 0x215   : > { %2313 = vmatpush1.bf16.msra.mxu0 %v2312_v16  ;;  %v2584_v16 = vpack.c.bf16 %v1531_v9, %v1529_v6  ;;  %v2598_v6 = vpack.c.bf16 %v1548_v61, %v1546_v15  ;;  %v968_v9 = vld [vmem:[#allocation9 + $0xbe8] sm:$0xff] }
 0x216   : > { %2569 = vmatpush1.bf16.msra.mxu1 %v2568_v18  ;;  %2315 = vmatprep.subr.bf16.mxu0 %v2314_v19  ;;  %v2330_v18 = vpack.c.bf16 %v954_v10, %v952_v34  ;;  %v951_v19 = vld [vmem:[#allocation9 + $0xb60] sm:$0xff]  ;;  %v970_v34 = vld [vmem:[#allocation9 + $0xbf8] sm:$0xff]  ;;  %v1550_v10 = vld [vmem:[#allocation9 + $0xde8] sm:$0xff] }
 0x217   : > { %2571 = vmatprep.subr.bf16.mxu1 %v2570_v25  ;;  %v1535_v25 = vld [vmem:[#allocation9 + $0xd70] sm:$0xff]  ;;  %v2332_v33 = vpack.c.bf16 %v953_v20, %v951_v19  ;;  %v1549_v20 = vld [vmem:[#allocation9 + $0xde0] sm:$0xff] }
 0x218   : > { %v969_v19 = vld [vmem:[#allocation9 + $0xbf0] sm:$0xff] }
 0x219   : > { %2317 = vmatpush1.bf16.msra.mxu0 %v2316_v35  ;;  %v2588_v35 = vpack.c.bf16 %v1535_v25, %v1533_v21  ;;  %v2602_v21 = vpack.c.bf16 %v1552_v26, %v1550_v10  ;;  %v562_v25 = vld [vmem:[#allocation9 + $0x8] sm:$0xff]  ;;  %v573_v10 = vld [vmem:[#allocation9 + $0x60] sm:$0xff]  ;;  %v575_v26 = vld [vmem:[#allocation9 + $0x70] sm:$0xff] }
 0x21a   : > { %2573 = vmatpush1.bf16.msra.mxu1 %v2572_v36  ;;  %2319 = vmatprep.subr.bf16.mxu0 %v2318_v38  ;;  %v2334_v36 = vpack.c.bf16 %v958_v14, %v956_v27  ;;  %v955_v38 = vld [vmem:[#allocation9 + $0xb80] sm:$0xff]  ;;  %v564_v27 = vld [vmem:[#allocation9 + $0x18] sm:$0xff]  ;;  %v1554_v14 = vld [vmem:[#allocation9 + $0xe08] sm:$0xff] }
 0x21b   : > { %2575 = vmatprep.subr.bf16.mxu1 %v2574_v43  ;;  %v1539_v43 = vld [vmem:[#allocation9 + $0xd90] sm:$0xff]  ;;  %v2336_v50 = vpack.c.bf16 %v957_v39, %v955_v38  ;;  %v2606_v39 = vpack.c.bf16 %v1556_v28, %v1554_v14  ;;  %v577_v14 = vld [vmem:[#allocation9 + $0x80] sm:$0xff] }
 0x21c   : > { %v563_v38 = vld [vmem:[#allocation9 + $0x10] sm:$0xff] }
 0x21d   : > { %2321 = vmatpush1.bf16.msra.mxu0 %v2320_v51  ;;  %v2592_v51 = vpack.c.bf16 %v1539_v43, %v1537_v40  ;;  %v1553_v40 = vld [vmem:[#allocation9 + $0xe00] sm:$0xff]  ;;  %v3448_v43 = vrot.slane %v2106_v17, %v3346_v32  ;;  %v1559_v17 = vld [vmem:[#allocation9 + $0xe30] sm:$0xff] }
 0x21e   : > { %2577 = vmatpush1.bf16.msra.mxu1 %v2576_v7  ;;  %2323 = vmatprep.subr.bf16.mxu0 %v2322_v30  ;;  %v2338_v7 = vpack.c.bf16 %v962_v45, %v960_v44  ;;  %v959_v30 = vld [vmem:[#allocation9 + $0xba0] sm:$0xff]  ;;  %v566_v44 = vld [vmem:[#allocation9 + $0x28] sm:$0xff]  ;;  %v568_v45 = vld [vmem:[#allocation9 + $0x38] sm:$0xff]  ;;  %v2612_v15 = vpack.c.bf16 %v1559_v17, %v1557_v57 }
 0x21f   : > { %2579 = vmatprep.subr.bf16.mxu1 %v2578_v59  ;;  %v1543_v59 = vld [vmem:[#allocation9 + $0xdb0] sm:$0xff]  ;;  %v2340_v63 = vpack.c.bf16 %v961_v52, %v959_v30  ;;  %v565_v30 = vld [vmem:[#allocation9 + $0x20] sm:$0xff]  ;;  %v2354_v62 = vpack.c.bf16 %v568_v45, %v566_v44  ;;  %v1233_v49 = vcombine.high %v3448_v43, %v3448_v43  ;;  %v588_v57 = vld [vmem:[#allocation9 + $0xd8] sm:$0xff] }
 0x220   : > { %v567_v52 = vld [vmem:[#allocation9 + $0x30] sm:$0xff]  ;;  %v1580_v17 = vld [vmem:[#allocation9 + $0xed8] sm:$0xff] }
 0x221   : > { %2325 = vmatpush1.bf16.msra.mxu0 %v2324_v0  ;;  %v2596_v0 = vpack.c.bf16 %v1543_v59, %v1541_v55  ;;  %v570_v55 = vld [vmem:[#allocation9 + $0x48] sm:$0xff]  ;;  %v1564_v59 = vld [vmem:[#allocation9 + $0xe58] sm:$0xff]  ;;  %v579_v28 = vld [vmem:[#allocation9 + $0x90] sm:$0xff] }
 0x222   : > { %2581 = vmatpush1.bf16.msra.mxu1 %v2580_v1  ;;  %2327 = vmatprep.subr.bf16.mxu0 %v2326_v3  ;;  %v2342_v1 = vpack.c.bf16 %v966_v2, %v964_v60  ;;  %v963_v3 = vld [vmem:[#allocation9 + $0xbc0] sm:$0xff]  ;;  %v1698_v60 = vcombine.high %v3454_v48, %v3454_v48  ;;  %v2356_v2 = vpack.c.bf16 %v567_v52, %v565_v30  ;;  %v1575_v30 = vld [vmem:[#allocation9 + $0xeb0] sm:$0xff]  ;;  %v586_v52 = vld [vmem:[#allocation9 + $0xc8] sm:$0xff] }
 0x223   : > { %2583 = vmatprep.subr.bf16.mxu1 %v2582_v8  ;;  %v1547_v8 = vld [vmem:[#allocation9 + $0xdd0] sm:$0xff]  ;;  %v2344_v11 = vpack.c.bf16 %v965_v4, %v963_v3  ;;  %v574_v4 = vld [vmem:[#allocation9 + $0x68] sm:$0xff] }
 0x224   : > { %v1563_v3 = vld [vmem:[#allocation9 + $0xe50] sm:$0xff] }
 0x225   : > { %2329 = vmatpush1.bf16.msra.mxu0 %v2328_v12  ;;  %v2600_v12 = vpack.c.bf16 %v1547_v8, %v1545_v5  ;;  %v576_v5 = vld [vmem:[#allocation9 + $0x78] sm:$0xff] }
 0x226   : > { %2585 = vmatpush1.bf16.msra.mxu1 %v2584_v16  ;;  %2331 = vmatprep.subr.bf16.mxu0 %v2330_v18  ;;  %v2346_v16 = vpack.c.bf16 %v970_v34, %v968_v9  ;;  %v967_v18 = vld [vmem:[#allocation9 + $0xbe0] sm:$0xff]  ;;  %v2362_v34 = vpack.c.bf16 %v576_v5, %v574_v4  ;;  %v591_v5 = vld [vmem:[#allocation9 + $0xf0] sm:$0xff] }
 0x227   : > { %2587 = vmatprep.subr.bf16.mxu1 %v2586_v24  ;;  %v1551_v24 = vld [vmem:[#allocation9 + $0xdf0] sm:$0xff]  ;;  %v2348_v22 = vpack.c.bf16 %v969_v19, %v967_v18  ;;  %v578_v18 = vld [vmem:[#allocation9 + $0x88] sm:$0xff]  ;;  %v580_v19 = vld [vmem:[#allocation9 + $0x98] sm:$0xff] }
 0x228   : > { %v589_v4 = vld [vmem:[#allocation9 + $0xe0] sm:$0xff] }
 0x229   : > { %2333 = vmatpush1.bf16.msra.mxu0 %v2332_v33  ;;  %v2604_v33 = vpack.c.bf16 %v1551_v24, %v1549_v20  ;;  %v1570_v20 = vld [vmem:[#allocation9 + $0xe88] sm:$0xff]  ;;  %v2364_v24 = vpack.c.bf16 %v575_v26, %v573_v10  ;;  %v1588_v26 = vld [vmem:[#allocation9 + $0xf18] sm:$0xff] }
 0x22a   : > { %2589 = vmatpush1.bf16.msra.mxu1 %v2588_v35  ;;  %2335 = vmatprep.subr.bf16.mxu0 %v2334_v36  ;;  %v2350_v35 = vpack.c.bf16 %v564_v27, %v562_v25  ;;  %v561_v36 = vld [vmem:[#allocation9] sm:$0xff]  ;;  %v2366_v27 = vpack.c.bf16 %v580_v19, %v578_v18  ;;  %v1586_v10 = vld [vmem:[#allocation9 + $0xf08] sm:$0xff]  ;;  %v595_v19 = vld [vmem:[#allocation9 + $0x110] sm:$0xff] }
 0x22b   : > { %2591 = vmatprep.subr.bf16.mxu1 %v2590_v41  ;;  %v1555_v41 = vld [vmem:[#allocation9 + $0xe10] sm:$0xff]  ;;  %v2352_v47 = vpack.c.bf16 %v563_v38, %v561_v36  ;;  %v582_v36 = vld [vmem:[#allocation9 + $0xa8] sm:$0xff]  ;;  %v584_v38 = vld [vmem:[#allocation9 + $0xb8] sm:$0xff] }
 0x22c   : > { %v2370_v45 = vpack.c.bf16 %v584_v38, %v582_v36  ;;  %v593_v18 = vld [vmem:[#allocation9 + $0x100] sm:$0xff]  ;;  %v599_v38 = vld [vmem:[#allocation9 + $0x130] sm:$0xff] }
 0x22d   : > { %2337 = vmatpush1.bf16.msra.mxu0 %v2336_v50  ;;  %v1558_v50 = vld [vmem:[#allocation9 + $0xe28] sm:$0xff]  ;;  %v597_v36 = vld [vmem:[#allocation9 + $0x120] sm:$0xff] }
 0x22e   : > { %2593 = vmatpush1.bf16.msra.mxu1 %v2592_v51  ;;  %2339 = vmatprep.subr.bf16.mxu0 %v2338_v7  ;;  %v1560_v51 = vld [vmem:[#allocation9 + $0xe38] sm:$0xff]  ;;  %v2608_v7 = vpack.c.bf16 %v1555_v41, %v1553_v40  ;;  %v2368_v41 = vpack.c.bf16 %v579_v28, %v577_v14  ;;  %v1590_v14 = vld [vmem:[#allocation9 + $0xf28] sm:$0xff] }
 0x22f   : > { %2595 = vmatprep.subr.bf16.mxu1 %v2594_v58  ;;  %v572_v58 = vld [vmem:[#allocation9 + $0x58] sm:$0xff]  ;;  %v2610_v13 = vpack.c.bf16 %v1560_v51, %v1558_v50  ;;  %v583_v50 = vld [vmem:[#allocation9 + $0xb0] sm:$0xff]  ;;  %v1573_v51 = vld [vmem:[#allocation9 + $0xea0] sm:$0xff] }
 0x230   : > { %v2358_v61 = vpack.c.bf16 %v572_v58, %v570_v55  ;;  %v1576_v40 = vld [vmem:[#allocation9 + $0xeb8] sm:$0xff]  ;;  %v2628_v58 = vpack.c.bf16 %v1575_v30, %v1573_v51  ;;  %v2388_v51 = vpack.c.bf16 %v599_v38, %v597_v36  ;;  %v1610_v36 = vld [vmem:[#allocation9 + $0xfc8] sm:$0xff] }
 0x231   : > { %2341 = vmatpush1.bf16.msra.mxu0 %v2340_v63  ;;  %v569_v63 = vld [vmem:[#allocation9 + $0x40] sm:$0xff]  ;;  %v1592_v28 = vld [vmem:[#allocation9 + $0xf38] sm:$0xff] }
 0x232   : > { %2597 = vmatpush1.bf16.msra.mxu1 %v2596_v0  ;;  %2343 = vmatprep.subr.bf16.mxu0 %v2342_v1  ;;  %v571_v0 = vld [vmem:[#allocation9 + $0x50] sm:$0xff]  ;;  %v2614_v1 = vpack.c.bf16 %v1564_v59, %v1562_v53  ;;  %v1577_v59 = vld [vmem:[#allocation9 + $0xec0] sm:$0xff]  ;;  %v1612_v38 = vld [vmem:[#allocation9 + $0xfd8] sm:$0xff] }
 0x233   : > { %2599 = vmatprep.subr.bf16.mxu1 %v2598_v6  ;;  %v1568_v6 = vld [vmem:[#allocation9 + $0xe78] sm:$0xff]  ;;  %v2360_v8 = vpack.c.bf16 %v571_v0, %v569_v63  ;;  %v587_v53 = vld [vmem:[#allocation9 + $0xd0] sm:$0xff]  ;;  %v1582_v63 = vld [vmem:[#allocation9 + $0xee8] sm:$0xff] }
 0x234   : > { %v1584_v0 = vld [vmem:[#allocation9 + $0xef8] sm:$0xff] }
 0x235   : > { %2345 = vmatpush1.bf16.msra.mxu0 %v2344_v11  ;;  %v1565_v11 = vld [vmem:[#allocation9 + $0xe60] sm:$0xff] }
 0x236   : > { %2601 = vmatpush1.bf16.msra.mxu1 %v2600_v12  ;;  %2347 = vmatprep.subr.bf16.mxu0 %v2346_v16  ;;  %v1567_v16 = vld [vmem:[#allocation9 + $0xe70] sm:$0xff] }
 0x237   : > { %2603 = vmatprep.subr.bf16.mxu1 %v2602_v21  ;;  %v1572_v21 = vld [vmem:[#allocation9 + $0xe98] sm:$0xff]  ;;  %v2620_v25 = vpack.c.bf16 %v1567_v16, %v1565_v11  ;;  %v2380_v11 = vpack.c.bf16 %v591_v5, %v589_v4  ;;  %v1602_v4 = vld [vmem:[#allocation9 + $0xf88] sm:$0xff] }
 0x238   : > { %v1604_v5 = vld [vmem:[#allocation9 + $0xf98] sm:$0xff] }
 0x239   : > { %2349 = vmatpush1.bf16.msra.mxu0 %v2348_v22  ;;  %v1569_v22 = vld [vmem:[#allocation9 + $0xe80] sm:$0xff] }
 0x23a   : > { %2605 = vmatpush1.bf16.msra.mxu1 %v2604_v33  ;;  %2351 = vmatprep.subr.bf16.mxu0 %v2350_v35  ;;  %v2622_v33 = vpack.c.bf16 %v1572_v21, %v1570_v20  ;;  %v1571_v35 = vld [vmem:[#allocation9 + $0xe90] sm:$0xff]  ;;  %v1585_v20 = vld [vmem:[#allocation9 + $0xf00] sm:$0xff]  ;;  %v2638_v21 = vpack.c.bf16 %v1588_v26, %v1586_v10  ;;  %v2654_v26 = vpack.c.bf16 %v1604_v5, %v1602_v4  ;;  %v1624_v4 = vld [vmem:[#allocation9 + $0x1038] sm:$0xff] }
 0x23b   : > { %2607 = vmatprep.subr.bf16.mxu1 %v2606_v39  ;;  %v1574_v39 = vld [vmem:[#allocation9 + $0xea8] sm:$0xff]  ;;  %v2624_v44 = vpack.c.bf16 %v1571_v35, %v1569_v22  ;;  %v2384_v22 = vpack.c.bf16 %v595_v19, %v593_v18  ;;  %v1601_v10 = vld [vmem:[#allocation9 + $0xf80] sm:$0xff]  ;;  %v1608_v19 = vld [vmem:[#allocation9 + $0xfb8] sm:$0xff] }
 0x23c   : > { %1211 = vmatmul.mubr.f32.vlgmr.msra.gmra.mrb[2].mxu0 %v3430_v42  ;;  %v1561_v42 = vld [vmem:[#allocation9 + $0xe40] sm:$0xff]  ;;  %v1606_v18 = vld [vmem:[#allocation9 + $0xfa8] sm:$0xff] }
 0x23d   : > { %1779 = vmatmul.mubr.f32.vlgmr.msra.gmra.mrb[0].mxu1 %v3436_v46  ;;  %2353 = vmatpush1.bf16.msra.mxu0 %v2352_v47  ;;  %v1566_v46 = vld [vmem:[#allocation9 + $0xe68] sm:$0xff]  ;;  %v2616_v9 = vpack.c.bf16 %v1563_v3, %v1561_v42  ;;  %v581_v47 = vld [vmem:[#allocation9 + $0xa0] sm:$0xff] }
 0x23e   : > { %1314 = vmatprep.mubr.f32.mxu0 %v1233_v49  ;;  %2609 = vmatpush1.bf16.msra.mxu1 %v2608_v7  ;;  %v2618_v12 = vpack.c.bf16 %v1568_v6, %v1566_v46  ;;  %v2626_v7 = vpack.c.bf16 %v1576_v40, %v1574_v39  ;;  %v2372_v55 = vpack.c.bf16 %v583_v50, %v581_v47  ;;  %v1581_v46 = vld [vmem:[#allocation9 + $0xee0] sm:$0xff]  ;;  %v1594_v47 = vld [vmem:[#allocation9 + $0xf48] sm:$0xff]  ;;  %v1596_v50 = vld [vmem:[#allocation9 + $0xf58] sm:$0xff] }
 0x23f   : > { %1849 = vmatprep.mubr.f32.mxu1 %v1698_v60  ;;  %2355 = vmatprep.subr.bf16.mxu0 %v2354_v62  ;;  %v1578_v62 = vld [vmem:[#allocation9 + $0xec8] sm:$0xff]  ;;  %v2374_v49 = vpack.c.bf16 %v588_v57, %v586_v52  ;;  %v2634_v6 = vpack.c.bf16 %v1584_v0, %v1582_v63  ;;  %v1589_v39 = vld [vmem:[#allocation9 + $0xf20] sm:$0xff]  ;;  %v2642_v40 = vpack.c.bf16 %v1592_v28, %v1590_v14  ;;  %v603_v57 = vld [vmem:[#allocation9 + $0x150] sm:$0xff] }
 0x240   : > { %2611 = vmatprep.subr.bf16.mxu1 %v2610_v13  ;;  %v585_v13 = vld [vmem:[#allocation9 + $0xc0] sm:$0xff]  ;;  %v2630_v60 = vpack.c.bf16 %v1580_v17, %v1578_v62  ;;  %v2646_v17 = vpack.c.bf16 %v1596_v50, %v1594_v47  ;;  %v2658_v28 = vpack.c.bf16 %v1608_v19, %v1606_v18  ;;  %v2662_v50 = vpack.c.bf16 %v1612_v38, %v1610_v36  ;;  %v1631_v19 = vld [vmem:[#allocation9 + $0x1070] sm:$0xff]  ;;  %v1642_v38 = vld [vmem:[#allocation9 + $0x10c8] sm:$0xff] }
 0x241   : > { %2357 = vmatpush1.bf16.msra.mxu0 %v2356_v2  ;;  %v1579_v2 = vld [vmem:[#allocation9 + $0xed0] sm:$0xff]  ;;  %v2376_v42 = vpack.c.bf16 %v587_v53, %v585_v13  ;;  %v601_v52 = vld [vmem:[#allocation9 + $0x140] sm:$0xff]  ;;  %v1598_v13 = vld [vmem:[#allocation9 + $0xf68] sm:$0xff] }
 0x242   : > { %2613 = vmatpush1.bf16.msra.mxu1 %v2612_v15  ;;  %2359 = vmatprep.subr.bf16.mxu0 %v2358_v61  ;;  %v590_v15 = vld [vmem:[#allocation9 + $0xe8] sm:$0xff]  ;;  %v592_v61 = vld [vmem:[#allocation9 + $0xf8] sm:$0xff]  ;;  %v1593_v62 = vld [vmem:[#allocation9 + $0xf40] sm:$0xff] }
 0x243   : > { %2615 = vmatprep.subr.bf16.mxu1 %v2614_v1  ;;  %v2632_v1 = vpack.c.bf16 %v1579_v2, %v1577_v59  ;;  %v2378_v3 = vpack.c.bf16 %v592_v61, %v590_v15  ;;  %v1600_v53 = vld [vmem:[#allocation9 + $0xf78] sm:$0xff]  ;;  %v2392_v59 = vpack.c.bf16 %v603_v57, %v601_v52  ;;  %v605_v15 = vld [vmem:[#allocation9 + $0x160] sm:$0xff]  ;;  %v607_v61 = vld [vmem:[#allocation9 + $0x170] sm:$0xff] }
 0x244   : > { %v1597_v63 = vld [vmem:[#allocation9 + $0xf60] sm:$0xff]  ;;  %v2650_v0 = vpack.c.bf16 %v1600_v53, %v1598_v13  ;;  %v1614_v52 = vld [vmem:[#allocation9 + $0xfe8] sm:$0xff]  ;;  %v1616_v57 = vld [vmem:[#allocation9 + $0xff8] sm:$0xff] }
 0x245   : > { %2361 = vmatpush1.bf16.msra.mxu0 %v2360_v8  ;;  %v1583_v8 = vld [vmem:[#allocation9 + $0xef0] sm:$0xff]  ;;  %v1605_v14 = vld [vmem:[#allocation9 + $0xfa0] sm:$0xff]  ;;  %v2666_v13 = vpack.c.bf16 %v1616_v57, %v1614_v52  ;;  %v1650_v57 = vld [vmem:[#allocation9 + $0x1108] sm:$0xff] }
 0x246   : > { %2617 = vmatpush1.bf16.msra.mxu1 %v2616_v9  ;;  %2363 = vmatprep.subr.bf16.mxu0 %v2362_v34  ;;  %v594_v9 = vld [vmem:[#allocation9 + $0x108] sm:$0xff]  ;;  %v596_v34 = vld [vmem:[#allocation9 + $0x118] sm:$0xff]  ;;  %v1609_v47 = vld [vmem:[#allocation9 + $0xfc0] sm:$0xff] }
 0x247   : > { %2619 = vmatprep.subr.bf16.mxu1 %v2618_v12  ;;  %v2636_v12 = vpack.c.bf16 %v1583_v8, %v1581_v46  ;;  %v2382_v16 = vpack.c.bf16 %v596_v34, %v594_v9  ;;  %v2396_v46 = vpack.c.bf16 %v607_v61, %v605_v15  ;;  %v609_v9 = vld [vmem:[#allocation9 + $0x180] sm:$0xff]  ;;  %v611_v34 = vld [vmem:[#allocation9 + $0x190] sm:$0xff] }
 0x248   : > { %v1613_v53 = vld [vmem:[#allocation9 + $0xfe0] sm:$0xff]  ;;  %v1639_v36 = vld [vmem:[#allocation9 + $0x10b0] sm:$0xff] }
 0x249   : > { %2365 = vmatpush1.bf16.msra.mxu0 %v2364_v24  ;;  %v1587_v24 = vld [vmem:[#allocation9 + $0xf10] sm:$0xff]  ;;  %v1629_v18 = vld [vmem:[#allocation9 + $0x1060] sm:$0xff] }
 0x24a   : > { %2621 = vmatpush1.bf16.msra.mxu1 %v2620_v25  ;;  %2367 = vmatprep.subr.bf16.mxu0 %v2366_v27  ;;  %v598_v25 = vld [vmem:[#allocation9 + $0x128] sm:$0xff]  ;;  %v600_v27 = vld [vmem:[#allocation9 + $0x138] sm:$0xff]  ;;  %v1647_v52 = vld [vmem:[#allocation9 + $0x10f0] sm:$0xff] }
 0x24b   : > { %2623 = vmatprep.subr.bf16.mxu1 %v2622_v33  ;;  %v2640_v33 = vpack.c.bf16 %v1587_v24, %v1585_v20  ;;  %v2386_v35 = vpack.c.bf16 %v600_v27, %v598_v25  ;;  %v2400_v20 = vpack.c.bf16 %v611_v34, %v609_v9  ;;  %v613_v25 = vld [vmem:[#allocation9 + $0x1a0] sm:$0xff]  ;;  %v615_v27 = vld [vmem:[#allocation9 + $0x1b0] sm:$0xff]  ;;  %v1626_v34 = vld [vmem:[#allocation9 + $0x1048] sm:$0xff] }
 0x24d   : > { %2369 = vmatpush1.bf16.msra.mxu0 %v2368_v41  ;;  %v1591_v41 = vld [vmem:[#allocation9 + $0xf30] sm:$0xff] }
 0x24e   : > { %2625 = vmatpush1.bf16.msra.mxu1 %v2624_v44  ;;  %2371 = vmatprep.subr.bf16.mxu0 %v2370_v45  ;;  %v602_v44 = vld [vmem:[#allocation9 + $0x148] sm:$0xff]  ;;  %v604_v45 = vld [vmem:[#allocation9 + $0x158] sm:$0xff] }
 0x24f   : > { %2627 = vmatprep.subr.bf16.mxu1 %v2626_v7  ;;  %v2644_v7 = vpack.c.bf16 %v1591_v41, %v1589_v39  ;;  %v2390_v30 = vpack.c.bf16 %v604_v45, %v602_v44  ;;  %v2404_v39 = vpack.c.bf16 %v615_v27, %v613_v25  ;;  %v617_v44 = vld [vmem:[#allocation9 + $0x1c0] sm:$0xff]  ;;  %v619_v45 = vld [vmem:[#allocation9 + $0x1d0] sm:$0xff] }
 0x250   : > { %v1633_v25 = vld [vmem:[#allocation9 + $0x1080] sm:$0xff]  ;;  %v1635_v27 = vld [vmem:[#allocation9 + $0x1090] sm:$0xff] }
 0x251   : > { %2373 = vmatpush1.bf16.msra.mxu0 %v2372_v55  ;;  %v1595_v55 = vld [vmem:[#allocation9 + $0xf50] sm:$0xff] }
 0x252   : > { %2629 = vmatpush1.bf16.msra.mxu1 %v2628_v58  ;;  %2375 = vmatprep.subr.bf16.mxu0 %v2374_v49  ;;  %v606_v58 = vld [vmem:[#allocation9 + $0x168] sm:$0xff]  ;;  %v608_v49 = vld [vmem:[#allocation9 + $0x178] sm:$0xff] }
 0x253   : > { %2631 = vmatprep.subr.bf16.mxu1 %v2630_v60  ;;  %v2648_v60 = vpack.c.bf16 %v1595_v55, %v1593_v62  ;;  %v2394_v2 = vpack.c.bf16 %v608_v49, %v606_v58  ;;  %v2408_v62 = vpack.c.bf16 %v619_v45, %v617_v44  ;;  %v621_v58 = vld [vmem:[#allocation9 + $0x1e0] sm:$0xff]  ;;  %v623_v49 = vld [vmem:[#allocation9 + $0x1f0] sm:$0xff] }
 0x254   : > { %v2412_v15 = vpack.c.bf16 %v623_v49, %v621_v58  ;;  %v1641_v44 = vld [vmem:[#allocation9 + $0x10c0] sm:$0xff]  ;;  %v1643_v45 = vld [vmem:[#allocation9 + $0x10d0] sm:$0xff] }
 0x255   : > { %2377 = vmatpush1.bf16.msra.mxu0 %v2376_v42  ;;  %v1599_v42 = vld [vmem:[#allocation9 + $0xf70] sm:$0xff]  ;;  %v1649_v58 = vld [vmem:[#allocation9 + $0x1100] sm:$0xff] }
 0x256   : > { %2633 = vmatpush1.bf16.msra.mxu1 %v2632_v1  ;;  %2379 = vmatprep.subr.bf16.mxu0 %v2378_v3  ;;  %v610_v1 = vld [vmem:[#allocation9 + $0x188] sm:$0xff]  ;;  %v612_v3 = vld [vmem:[#allocation9 + $0x198] sm:$0xff]  ;;  %v1651_v49 = vld [vmem:[#allocation9 + $0x1110] sm:$0xff] }
 0x257   : > { %2635 = vmatprep.subr.bf16.mxu1 %v2634_v6  ;;  %v2652_v6 = vpack.c.bf16 %v1599_v42, %v1597_v63  ;;  %v2398_v8 = vpack.c.bf16 %v612_v3, %v610_v1  ;;  %v1619_v42 = vld [vmem:[#allocation9 + $0x1010] sm:$0xff]  ;;  %v3466_v1 = vrot.slane %v1699_v54, %v3346_v32  ;;  %v1622_v3 = vld [vmem:[#allocation9 + $0x1028] sm:$0xff]  ;;  %v1625_v54 = vld [vmem:[#allocation9 + $0x1040] sm:$0xff] }
 0x259   : > { %2381 = vmatpush1.bf16.msra.mxu0 %v2380_v11  ;;  %v1603_v11 = vld [vmem:[#allocation9 + $0xf90] sm:$0xff]  ;;  %v1707_v9 = vcombine.high %v3466_v1, %v3466_v1 }
 0x25a   : > { %2637 = vmatpush1.bf16.msra.mxu1 %v2636_v12  ;;  %2383 = vmatprep.subr.bf16.mxu0 %v2382_v16  ;;  %v614_v12 = vld [vmem:[#allocation9 + $0x1a8] sm:$0xff]  ;;  %v616_v16 = vld [vmem:[#allocation9 + $0x1b8] sm:$0xff] }
 0x25b   : > { %2639 = vmatprep.subr.bf16.mxu1 %v2638_v21  ;;  %v2656_v21 = vpack.c.bf16 %v1603_v11, %v1601_v10  ;;  %v2402_v24 = vpack.c.bf16 %v616_v16, %v614_v12  ;;  %v1628_v10 = vld [vmem:[#allocation9 + $0x1058] sm:$0xff]  ;;  %v1630_v11 = vld [vmem:[#allocation9 + $0x1068] sm:$0xff] }
 0x25c   : > { %v2678_v37 = vpack.c.bf16 %v1628_v10, %v1626_v34  ;;  %v1632_v12 = vld [vmem:[#allocation9 + $0x1078] sm:$0xff]  ;;  %v1663_v34 = vld [vmem:[#allocation9 + $0x1170] sm:$0xff]  ;;  %v1666_v10 = vld [vmem:[#allocation9 + $0x1188] sm:$0xff] }
 0x25d   : > { %2385 = vmatpush1.bf16.msra.mxu0 %v2384_v22  ;;  %v1607_v22 = vld [vmem:[#allocation9 + $0xfb0] sm:$0xff] }
 0x25e   : > { %2641 = vmatpush1.bf16.msra.mxu1 %v2640_v33  ;;  %2387 = vmatprep.subr.bf16.mxu0 %v2386_v35  ;;  %v618_v33 = vld [vmem:[#allocation9 + $0x1c8] sm:$0xff]  ;;  %v620_v35 = vld [vmem:[#allocation9 + $0x1d8] sm:$0xff] }
 0x25f   : > { %2643 = vmatprep.subr.bf16.mxu1 %v2642_v40  ;;  %v2660_v40 = vpack.c.bf16 %v1607_v22, %v1605_v14  ;;  %v2406_v41 = vpack.c.bf16 %v620_v35, %v618_v33  ;;  %v1638_v14 = vld [vmem:[#allocation9 + $0x10a8] sm:$0xff]  ;;  %v2688_v22 = vpack.c.bf16 %v1635_v27, %v1633_v25  ;;  %v1637_v35 = vld [vmem:[#allocation9 + $0x10a0] sm:$0xff] }
 0x260   : > { %v1673_v27 = vld [vmem:[#allocation9 + $0x11c0] sm:$0xff] }
 0x261   : > { %2389 = vmatpush1.bf16.msra.mxu0 %v2388_v51  ;;  %v1611_v51 = vld [vmem:[#allocation9 + $0xfd0] sm:$0xff] }
 0x262   : > { %2645 = vmatpush1.bf16.msra.mxu1 %v2644_v7  ;;  %2391 = vmatprep.subr.bf16.mxu0 %v2390_v30  ;;  %v622_v7 = vld [vmem:[#allocation9 + $0x1e8] sm:$0xff]  ;;  %v624_v30 = vld [vmem:[#allocation9 + $0x1f8] sm:$0xff] }
 0x263   : > { %2647 = vmatprep.subr.bf16.mxu1 %v2646_v17  ;;  %v2664_v17 = vpack.c.bf16 %v1611_v51, %v1609_v47  ;;  %v2410_v55 = vpack.c.bf16 %v624_v30, %v622_v7  ;;  %v1646_v47 = vld [vmem:[#allocation9 + $0x10e8] sm:$0xff]  ;;  %v2696_v51 = vpack.c.bf16 %v1643_v45, %v1641_v44  ;;  %v1645_v30 = vld [vmem:[#allocation9 + $0x10e0] sm:$0xff] }
 0x264   : > { %v1929_v44 = vld [vmem:[#allocation11] sm:$0x3] }
 0x265   : > { %2393 = vmatpush1.bf16.msra.mxu0 %v2392_v59  ;;  %v1615_v59 = vld [vmem:[#allocation9 + $0xff0] sm:$0xff]  ;;  %v1934_v45 = vrot.slane %v1929_v44, %v343_v29 }
 0x266   : > { %2649 = vmatpush1.bf16.msra.mxu1 %v2648_v60  ;;  %2395 = vmatprep.subr.bf16.mxu0 %v2394_v2  ;;  %v1618_v60 = vld [vmem:[#allocation9 + $0x1008] sm:$0xff]  ;;  %v1620_v2 = vld [vmem:[#allocation9 + $0x1018] sm:$0xff]  ;;  %v2668_v61 = vpack.c.bf16 %v1615_v59, %v1613_v53  ;;  %v2704_v59 = vpack.c.bf16 %v1651_v49, %v1649_v58 }
 0x267   : > { %2651 = vmatprep.subr.bf16.mxu1 %v2650_v0  ;;  %v2670_v63 = vpack.c.bf16 %v1620_v2, %v1618_v60  ;;  %v1617_v0 = vld [vmem:[#allocation9 + $0x1000] sm:$0xff]  ;;  %v1656_v53 = vld [vmem:[#allocation9 + $0x1138] sm:$0xff] }
 0x268   : > { %v2672_v5 = vpack.c.bf16 %v1619_v42, %v1617_v0  ;;  %v1653_v2 = vld [vmem:[#allocation9 + $0x1120] sm:$0xff] }
 0x269   : > { %2397 = vmatpush1.bf16.msra.mxu0 %v2396_v46  ;;  %v2674_v46 = vpack.c.bf16 %v1624_v4, %v1622_v3  ;;  %v1657_v3 = vld [vmem:[#allocation9 + $0x1140] sm:$0xff]  ;;  %v1659_v4 = vld [vmem:[#allocation9 + $0x1150] sm:$0xff] }
 0x26a   : > { %2653 = vmatpush1.bf16.msra.mxu1 %v2652_v6  ;;  %2399 = vmatprep.subr.bf16.mxu0 %v2398_v8  ;;  %v1621_v6 = vld [vmem:[#allocation9 + $0x1020] sm:$0xff]  ;;  %v1623_v8 = vld [vmem:[#allocation9 + $0x1030] sm:$0xff] }
 0x26b   : > { %2655 = vmatprep.subr.bf16.mxu1 %v2654_v26  ;;  %v2676_v56 = vpack.c.bf16 %v1623_v8, %v1621_v6  ;;  %v1627_v26 = vld [vmem:[#allocation9 + $0x1050] sm:$0xff]  ;;  %v2712_v6 = vpack.c.bf16 %v1659_v4, %v1657_v3 }
 0x26c   : > { %v2680_v16 = vpack.c.bf16 %v1627_v26, %v1625_v54  ;;  %v1665_v26 = vld [vmem:[#allocation9 + $0x1180] sm:$0xff] }
 0x26d   : > { %2401 = vmatpush1.bf16.msra.mxu0 %v2400_v20  ;;  %v1634_v20 = vld [vmem:[#allocation9 + $0x1088] sm:$0xff] }
 0x26e   : > { %2657 = vmatpush1.bf16.msra.mxu1 %v2656_v21  ;;  %2403 = vmatprep.subr.bf16.mxu0 %v2402_v24  ;;  %v1636_v21 = vld [vmem:[#allocation9 + $0x1098] sm:$0xff]  ;;  %v2684_v24 = vpack.c.bf16 %v1631_v19, %v1629_v18  ;;  %v1669_v19 = vld [vmem:[#allocation9 + $0x11a0] sm:$0xff] }
 0x26f   : > { %2659 = vmatprep.subr.bf16.mxu1 %v2658_v28  ;;  %v1640_v28 = vld [vmem:[#allocation9 + $0x10b8] sm:$0xff] }
 0x270   : > { %v2690_v33 = vpack.c.bf16 %v1640_v28, %v1638_v14  ;;  %v1675_v14 = vld [vmem:[#allocation9 + $0x11d0] sm:$0xff]  ;;  %v1678_v28 = vld [vmem:[#allocation9 + $0x11e8] sm:$0xff] }
 0x271   : > { %2405 = vmatpush1.bf16.msra.mxu0 %v2404_v39  ;;  %v1644_v39 = vld [vmem:[#allocation9 + $0x10d8] sm:$0xff] }
 0x272   : > { %2661 = vmatpush1.bf16.msra.mxu1 %v2660_v40  ;;  %2407 = vmatprep.subr.bf16.mxu0 %v2406_v41  ;;  %v2692_v40 = vpack.c.bf16 %v1639_v36, %v1637_v35  ;;  %v2694_v41 = vpack.c.bf16 %v1644_v39, %v1642_v38  ;;  %v1677_v36 = vld [vmem:[#allocation9 + $0x11e0] sm:$0xff]  ;;  %v1679_v38 = vld [vmem:[#allocation9 + $0x11f0] sm:$0xff] }
 0x273   : > { %2663 = vmatprep.subr.bf16.mxu1 %v2662_v50  ;;  %v1648_v50 = vld [vmem:[#allocation9 + $0x10f8] sm:$0xff]  ;;  %v2732_v39 = vpack.c.bf16 %v1679_v38, %v1677_v36 }
 0x274   : > { %v2698_v7 = vpack.c.bf16 %v1648_v50, %v1646_v47  ;;  %v1938_v50 = vrot.slane %v1929_v44, %v347_v31 }
 0x275   : > { %2409 = vmatpush1.bf16.msra.mxu0 %v2408_v62  ;;  %v1652_v62 = vld [vmem:[#allocation9 + $0x1118] sm:$0xff] }
 0x276   : > { %2665 = vmatpush1.bf16.msra.mxu1 %v2664_v17  ;;  %2411 = vmatprep.subr.bf16.mxu0 %v2410_v55  ;;  %v2700_v17 = vpack.c.bf16 %v1647_v52, %v1645_v30  ;;  %v2702_v55 = vpack.c.bf16 %v1652_v62, %v1650_v57 }
 0x277   : > { %2667 = vmatprep.subr.bf16.mxu1 %v2666_v13  ;;  %v1654_v13 = vld [vmem:[#allocation9 + $0x1128] sm:$0xff] }
 0x278   : > { %v2706_v60 = vpack.c.bf16 %v1656_v53, %v1654_v13 }
 0x279   : > { %2413 = vmatpush1.bf16.msra.mxu0 %v2412_v15  ;;  %v1655_v15 = vld [vmem:[#allocation9 + $0x1130] sm:$0xff] }
 0x27a   : > { %2669 = vmatpush1.bf16.msra.mxu1 %v2668_v61  ;;  %v1658_v61 = vld [vmem:[#allocation9 + $0x1148] sm:$0xff]  ;;  %v2708_v0 = vpack.c.bf16 %v1655_v15, %v1653_v2 }
 0x27b   : > { %2671 = vmatprep.subr.bf16.mxu1 %v2670_v63  ;;  %v1660_v63 = vld [vmem:[#allocation9 + $0x1158] sm:$0xff] }
 0x27c   : > { %1315 = vmatmul.mubr.f32.vlgmr.msra.gmra.mrb[2].mxu0 %v3448_v43  ;;  %v2682_v43 = vpack.c.bf16 %v1632_v12, %v1630_v11  ;;  %v2710_v42 = vpack.c.bf16 %v1660_v63, %v1658_v61  ;;  %v1667_v11 = vld [vmem:[#allocation9 + $0x1190] sm:$0xff]  ;;  %v1670_v12 = vld [vmem:[#allocation9 + $0x11a8] sm:$0xff] }
 0x27d   : > { %1850 = vmatmul.mubr.f32.vlgmr.msra.gmra.mrb[0].mxu1 %v3454_v48  ;;  %v2686_v48 = vpack.c.bf16 %v1636_v21, %v1634_v20  ;;  %v1671_v20 = vld [vmem:[#allocation9 + $0x11b0] sm:$0xff]  ;;  %v1674_v21 = vld [vmem:[#allocation9 + $0x11c8] sm:$0xff] }
 0x27e   : > { %2673 = vmatpush1.bf16.msra.mxu1 %v2672_v5  ;;  %1920 = vmatprep.mubr.f32.mxu1 %v1707_v9  ;;  %v1662_v5 = vld [vmem:[#allocation9 + $0x1168] sm:$0xff]  ;;  %v1661_v9 = vld [vmem:[#allocation9 + $0x1160] sm:$0xff] }
 0x27f   : > { %2675 = vmatprep.subr.bf16.mxu1 %v2674_v46  ;;  %v1664_v46 = vld [vmem:[#allocation9 + $0x1178] sm:$0xff] }
 0x280   : > { %v2714_v8 = vpack.c.bf16 %v1664_v46, %v1662_v5 }
 0x282   : > { %2677 = vmatpush1.bf16.msra.mxu1 %v2676_v56  ;;  %v1668_v56 = vld [vmem:[#allocation9 + $0x1198] sm:$0xff] }
 0x283   : > { %2679 = vmatprep.subr.bf16.mxu1 %v2678_v37  ;;  %v2716_v37 = vpack.c.bf16 %v1663_v34, %v1661_v9  ;;  %v2718_v54 = vpack.c.bf16 %v1668_v56, %v1666_v10 }
 0x286   : > { %2681 = vmatpush1.bf16.msra.mxu1 %v2680_v16  ;;  %v1672_v16 = vld [vmem:[#allocation9 + $0x11b8] sm:$0xff] }
 0x287   : > { %2683 = vmatprep.subr.bf16.mxu1 %v2682_v43  ;;  %v2720_v43 = vpack.c.bf16 %v1667_v11, %v1665_v26  ;;  %v2722_v18 = vpack.c.bf16 %v1672_v16, %v1670_v12 }
 0x28a   : > { %2685 = vmatpush1.bf16.msra.mxu1 %v2684_v24  ;;  %v1676_v24 = vld [vmem:[#allocation9 + $0x11d8] sm:$0xff] }
 0x28b   : > { %2687 = vmatprep.subr.bf16.mxu1 %v2686_v48  ;;  %v2724_v48 = vpack.c.bf16 %v1671_v20, %v1669_v19  ;;  %v2726_v25 = vpack.c.bf16 %v1676_v24, %v1674_v21 }
 0x28e   : > { %2689 = vmatpush1.bf16.msra.mxu1 %v2688_v22  ;;  %v1680_v22 = vld [vmem:[#allocation9 + $0x11f8] sm:$0xff] }
 0x28f   : > { %2691 = vmatprep.subr.bf16.mxu1 %v2690_v33  ;;  %v2728_v33 = vpack.c.bf16 %v1675_v14, %v1673_v27  ;;  %v2730_v35 = vpack.c.bf16 %v1680_v22, %v1678_v28 }
 0x292   : > { %2693 = vmatpush1.bf16.msra.mxu1 %v2692_v40 }
 0x293   : > { %2695 = vmatprep.subr.bf16.mxu1 %v2694_v41 }
 0x296   : > { %2697 = vmatpush1.bf16.msra.mxu1 %v2696_v51 }
 0x297   : > { %2699 = vmatprep.subr.bf16.mxu1 %v2698_v7 }
 0x29a   : > { %2701 = vmatpush1.bf16.msra.mxu1 %v2700_v17 }
 0x29b   : > { %2703 = vmatprep.subr.bf16.mxu1 %v2702_v55 }
 0x29e   : > { %2705 = vmatpush1.bf16.msra.mxu1 %v2704_v59 }
 0x29f   : > { %2707 = vmatprep.subr.bf16.mxu1 %v2706_v60 }
 0x2a2   : > { %2709 = vmatpush1.bf16.msra.mxu1 %v2708_v0 }
 0x2a3   : > { %2711 = vmatprep.subr.bf16.mxu1 %v2710_v42 }
 0x2a6   : > { %2713 = vmatpush1.bf16.msra.mxu1 %v2712_v6 }
 0x2a7   : > { %2715 = vmatprep.subr.bf16.mxu1 %v2714_v8 }
 0x2aa   : > { %2717 = vmatpush1.bf16.msra.mxu1 %v2716_v37 }
 0x2ab   : > { %2719 = vmatprep.subr.bf16.mxu1 %v2718_v54 }
 0x2ae   : > { %2721 = vmatpush1.bf16.msra.mxu1 %v2720_v43 }
 0x2af   : > { %2723 = vmatprep.subr.bf16.mxu1 %v2722_v18 }
 0x2b2   : > { %2725 = vmatpush1.bf16.msra.mxu1 %v2724_v48 }
 0x2b3   : > { %2727 = vmatprep.subr.bf16.mxu1 %v2726_v25 }
 0x2b6   : > { %2729 = vmatpush1.bf16.msra.mxu1 %v2728_v33 }
 0x2b7   : > { %2731 = vmatprep.subr.bf16.mxu1 %v2730_v35 }
 0x2ba   : > { %2733 = vmatpush1.bf16.msra.mxu1 %v2732_v39 }
 0x2bd   : > { %1921 = vmatmul.mubr.f32.vlgmr.msra.gmra.mrb[0].mxu1 %v3466_v1 }
 0x34f   : > { %v1316_v40 = vpop.f32.mrb[2].mxu0 }
 0x350   : > { %v1318_v41 = vpop.f32.mrb[3].mxu0 }
 0x390   : > { %v1922_v47 = vpop.f32.mrb[0].mxu1 }
 0x391   : > { %v2734_v51 = vadd.f32 %v1922_v47, %v1316_v40  ;;  %v1924_v7 = vpop.f32.mrb[1].mxu1 }
 0x392   : > { %v2735_v30 = vadd.f32 %v1924_v7, %v1318_v41 }
 0x393   : > { %v1941_v52 = vadd.f32 %v2734_v51, %v1934_v45 }
 0x394   : > { %v1942_v57 = vadd.f32 %v2735_v30, %v1938_v50 }
 0x396   : > { %v1945_v62 = vcombine.low %v1941_v52, %v1942_v57 }
 0x398   : > { %v1952_v1 = vrot.slane %v1945_v62, %v3346_v32  ;;  %2110 = vst.sshfl [vmem:[%s296_s24] sm:$0x33 pattern:$0x76325410] %v1945_v62 }
 0x39a   : > { %v1953_v23 = vcombine.high %v1952_v1, %v1952_v1 }
 0x39c   : > { %1957 = vst [vmem:[%s296_s24 + $0x4] sm:$0xf] %v1953_v23 }
 0x39d   : > { %3004 = shalt.err (!%p3001_p13)
}
 0x39e   : > { %s3005_s13 = scalar_lea.hbm %s3486_s8, 128  ;;  %s3009_s17 = scalar_lea.hbm %s3535_s5, 256 }
 0x39f   : > { %p3006_p9 = scmp.ne.s32.totalorder %s3486_s8, %s3005_s13  ;;  %p3010_p6 = scmp.lt.u32.totalorder %s3486_s8, %s3535_s5 }
 0x3a0   : > { %p3011_p4 = scmp.lt.u32.totalorder %s3009_s17, %s3005_s13  ;;  %p3013_p3 = scmp.lt.u32.totalorder %s3005_s13, %s3486_s8 }
 0x3a1   : > { %p3007_p0 = pnand %p3006_p9, %p3270_p10 }
 0x3a2   : > { %p3012_p8 = por %p3011_p4, %p3010_p6 }
 0x3a3   : > { %p3008_p11 = pneg %p3007_p0 }
 0x3a4   : > { %p3014_p5 = por %p3013_p3, %p3012_p8 }
 0x3a6   : > { %p3015_p7 = pnand %p3014_p5, %p3008_p11 }
 0x3a8   : > { %3018 = shalt.err (!%p3015_p7)
}
 0x3a9   : > { %s3079_s9 = smov 64   ;;  %s3080_s11 = smov 4  }
 0x3aa   : > { %2768 = dma.vmem_to_hbm [thread:$0]  (%p3270_p10), %s3481_s26, 128, %s3486_s8, %s1959_s27, %s3079_s9, %s3079_s9, %s3080_s11  }
 0x3ab PF: > { %s1987_s12 = sand.u32 1, %s3053_s18   ;;  %p3553_p12 = scmp.ne.s32.totalorder %s3540_s25, 0 }
 0x3ac   : > { %p3554_p2 = scmp.ge.s32.totalorder %s3065_s21, 2  ;;  %s1988_s30 = scalar_lea.sflag [#allocation5], %s1987_s12 }
 0x3ae   : > { %p2788_p1 = pnand %p3554_p2, %p3553_p12 }
 0x3b0   : > { %3048 = dma.done.wait (!%p2788_p1), %s1988_s30, 128  }
 0x3b1   : > { %3050 = vsyncadd (!%p2788_p1), %s1988_s30, 4294967168  ;;  %p20_p13 = scmp.ge.s32.totalorder %s3260_s14, 4   ;;  %s3555_s18 = smov %s3057_s19 }
 0x3b2   : > { %s3556_s19 = smov %s3061_s20  ;;  %s3557_s20 = smov %s3276_s23 }
 0x3b3   : > { %s3558_s21 = smov %s3260_s14  ;;  %22 = sbr.rel (!%p20_p13) target bundleno = 7 (0x7), region = 108 }
 0x3ba   :  { %1993 = vsyncpa [#allocation4], 1 }
 0x3bb   :  { %1995 = vsyncpa [#allocation4 + $0x1], 1 }
 0x3bc   :  { %1996 = vsyncpa [#allocation7], 1 }
 0x3bd   :  { %1997 = vsyncpa [#allocation10], 1 }
 0x3be   :  { %1998 = vsyncpa [#allocation5], 1 }
 0x3bf   :  { %2000 = vsyncpa [#allocation5 + $0x1], 1 }

</bundles_post_ra>
